<compile_context>
chip_gen: v5e
topology: v5e:2x2
jax: 0.10.0
libtpu: 0.0.40
codegen_flags: <defaults>
</compile_context>

<pallas_src>
import functools

import jax
import jax.numpy as jnp
import numpy as np
from jax.experimental import pallas as pl
from jax.experimental.pallas import tpu as pltpu


def _make_lstm_kernel(layers: int, seq_len: int, batch: int, hidden: int):
    """Kernel body for static (layers, T, B_padded, H)."""
    T, B, H = seq_len, batch, hidden

    def kernel(*refs):
        # refs: x_ref,
        #       [w_ih, w_hh, b] * layers   (fused gates, 0.5-folded i/f/o cols)
        #       fc_w (lane-padded), fc_b (lane-padded),
        #       out_ref,
        #       seq_ref (scratch, (T*B, H))
        x_ref = refs[0]
        idx = 1
        layer_params = []
        for _ in range(layers):
            layer_params.append(refs[idx:idx + 3])
            idx += 3
        fc_w_ref, fc_b_ref = refs[idx], refs[idx + 1]
        out_ref = refs[idx + 2]
        seq_ref = refs[idx + 3]

        # Constant lane masks for the tanh-based sigmoid, built ONCE (hoisted
        # out of all loops; JAX does not CSE broadcasts).
        #   i/f/o lanes: 0.5*tanh(0.5 z) + 0.5 == sigmoid(z)
        #   g lanes    : 1.0*tanh(z)     + 0.0
        col = jax.lax.broadcasted_iota(jnp.int32, (B, 4 * H), 1)
        is_g = jnp.logical_and(col >= 2 * H, col < 3 * H)
        gate_scale = jnp.where(is_g, 1.0, 0.5).astype(jnp.float32)
        gate_shift = jnp.where(is_g, 0.0, 0.5).astype(jnp.float32)

        for l, (w_ih, w_hh, b) in enumerate(layer_params):
            # Input to this layer: original x for layer 0, previous layer's
            # full sequence otherwise (read once, before it is overwritten).
            layer_in = x_ref[...] if l == 0 else seq_ref[...]

            # Hoisted input projection for ALL timesteps:
            # one (T*B, din) x (din, 4H) MXU matmul, bias folded in here.
            xproj = jnp.dot(layer_in, w_ih[...],
                            preferred_element_type=jnp.float32) + b[...]
            w_hh_v = w_hh[...]                       # (H, 4H), lives in vregs

            h = jnp.zeros((B, H), jnp.float32)
            c = jnp.zeros((B, H), jnp.float32)

            # T is small & static -> fully unrolled; h/c stay in registers.
            for t in range(T):
                gates = xproj[t * B:(t + 1) * B, :] + jnp.dot(
                    h, w_hh_v, preferred_element_type=jnp.float32)  # (B, 4H)

                # Single 128-lane tanh gives tanh(0.5 z) on i/f/o lanes and
                # tanh(z) on g lanes (scaling pre-folded into the weights).
                act = jnp.tanh(gates) * gate_scale + gate_shift

                i_g = act[:, 0:H]
                f_g = act[:, H:2 * H]
                g_g = act[:, 2 * H:3 * H]
                o_g = act[:, 3 * H:4 * H]

                c = f_g * c + i_g * g_g
                h = o_g * jnp.tanh(c)

                # Full-sublane-group, statically-offset store (B == 8).
                seq_ref[pl.ds(t * B, B), :] = h

        # Final Linear (lane-padded width) + ReLU: one MXU matmul, one
        # unmasked lane-dense store.
        y = jnp.dot(seq_ref[...], fc_w_ref[...],
                    preferred_element_type=jnp.float32) + fc_b_ref[...]
        out_ref[...] = jnp.maximum(y, 0.0)

    return kernel


def init_params(key, input_dim, hidden_dim, output_dim, layers):
    """Deterministic synthetic parameters (PyTorch-like uniform init).

    Gate weights stored fused: (din, 4H) / (H, 4H) / (1, 4H) with PyTorch
    gate order [i, f, g, o] along the last dimension.
    """
    params = {}
    H = hidden_dim
    bound = 1.0 / np.sqrt(hidden_dim)
    for l in range(layers):
        din = input_dim if l == 0 else hidden_dim
        key, k1, k2, k3, k4 = jax.random.split(key, 5)
        params[f"w_ih{l}"] = jax.random.uniform(
            k1, (din, 4 * H), jnp.float32, -bound, bound)
        params[f"w_hh{l}"] = jax.random.uniform(
            k2, (H, 4 * H), jnp.float32, -bound, bound)
        params[f"b_ih{l}"] = jax.random.uniform(
            k3, (1, 4 * H), jnp.float32, -bound, bound)
        params[f"b_hh{l}"] = jax.random.uniform(
            k4, (1, 4 * H), jnp.float32, -bound, bound)
    key, k5, k6 = jax.random.split(key, 3)
    params["fc_w"] = jax.random.uniform(
        k5, (hidden_dim, output_dim), jnp.float32, -bound, bound)
    params["fc_b"] = jax.random.uniform(
        k6, (1, output_dim), jnp.float32, -bound, bound)
    return params


def prepare_params(params, hidden_dim, output_dim, layers):
    """One-time parameter preparation (kept OUT of the per-call jit):

      * fuse b_ih + b_hh,
      * fold the 0.5 tanh-sigmoid pre-scale into the i/f/o columns of
        W_ih, W_hh and the fused bias (g columns left unscaled),
      * lane-pad fc_w / fc_b to a 128-wide output.
    """
    H, O = hidden_dim, output_dim
    O_pad = ((O + 127) // 128) * 128

    col_scale = np.full((1, 4 * H), 0.5, np.float32)
    col_scale[0, 2 * H:3 * H] = 1.0            # g gate columns unscaled
    col_scale = jnp.asarray(col_scale)

    prepared = []
    for l in range(layers):
        w_ih = params[f"w_ih{l}"] * col_scale
        w_hh = params[f"w_hh{l}"] * col_scale
        b = (params[f"b_ih{l}"] + params[f"b_hh{l}"]) * col_scale
        prepared += [w_ih, w_hh, b]

    fc_w_pad = jnp.zeros((H, O_pad), jnp.float32).at[:, :O].set(params["fc_w"])
    fc_b_pad = jnp.zeros((1, O_pad), jnp.float32).at[:, :O].set(params["fc_b"])
    prepared += [fc_w_pad, fc_b_pad]
    return tuple(jax.device_put(p) for p in prepared)


@functools.partial(jax.jit,
                   static_argnames=("hidden_dim", "output_dim", "layers"))
def lstm_base_forward(x, prepared, *, hidden_dim, output_dim, layers):
    """x: (B, T, input_dim) batch-first float32  ->  (B, T, output_dim)."""
    B, T, D = x.shape
    H, O = hidden_dim, output_dim
    O_pad = ((O + 127) // 128) * 128
    Bp = ((B + 7) // 8) * 8                      # pad batch to a sublane group

    # Time-major, batch zero-padded to Bp, flattened to (T*Bp, D) so every
    # matmul is a single 2-D GEMM and per-step tiles are whole (8,128) vregs.
    x_tm = jnp.transpose(x, (1, 0, 2)).astype(jnp.float32)      # (T, B, D)
    if Bp != B:
        x_tm = jnp.pad(x_tm, ((0, 0), (0, Bp - B), (0, 0)))     # zero rows
    x_flat = x_tm.reshape(T * Bp, D)

    vmem = pl.BlockSpec(memory_space=pltpu.MemorySpace.VMEM)
    n_in = 1 + len(prepared)
    out_flat = pl.pallas_call(
        _make_lstm_kernel(layers=layers, seq_len=T, batch=Bp, hidden=H),
        out_shape=jax.ShapeDtypeStruct((T * Bp, O_pad), jnp.float32),
        in_specs=[vmem] * n_in,
        out_specs=vmem,
        scratch_shapes=[
            pltpu.VMEM((T * Bp, H), jnp.float32),    # per-layer sequence buffer
        ],
    )(x_flat, *prepared)

    out_tm = out_flat.reshape(T, Bp, O_pad)[:, :B, :O]
    return jnp.transpose(out_tm, (1, 0, 2))          # back to (B, T, O)


def _reference_forward(x, params, hidden_dim, output_dim, layers):
    """Pure-JAX reference with nn.LSTM semantics (standard sigmoid),
    using the RAW (un-prepared) parameters."""
    B, T, _ = x.shape
    H = hidden_dim
    seq = x.astype(jnp.float32)
    for l in range(layers):
        w_ih, w_hh = params[f"w_ih{l}"], params[f"w_hh{l}"]
        b_ih, b_hh = params[f"b_ih{l}"], params[f"b_hh{l}"]
        h = jnp.zeros((B, H), jnp.float32)
        c = jnp.zeros((B, H), jnp.float32)
        outs = []
        for t in range(T):
            g = seq[:, t, :] @ w_ih + h @ w_hh + b_ih + b_hh
            i_g = jax.nn.sigmoid(g[:, 0:H])
            f_g = jax.nn.sigmoid(g[:, H:2 * H])
            g_g = jnp.tanh(g[:, 2 * H:3 * H])
            o_g = jax.nn.sigmoid(g[:, 3 * H:4 * H])
            c = f_g * c + i_g * g_g
            h = o_g * jnp.tanh(c)
            outs.append(h)
        seq = jnp.stack(outs, axis=1)
    y = seq @ params["fc_w"] + params["fc_b"]
    return jnp.maximum(y, 0.0)


if __name__ == "__main__":
    # Small shapes implied by the module: batch=2, seq=8, input_dim=8,
    # hidden_dim=32 (4H = 128 lanes), output_dim=4, layers=2.
    B, T, INPUT_DIM, HIDDEN_DIM, OUTPUT_DIM, LAYERS = 2, 8, 8, 32, 4, 2

    key = jax.random.PRNGKey(0)
    key, xkey = jax.random.split(key)
    x = jax.random.normal(xkey, (B, T, INPUT_DIM), jnp.float32)
    params = init_params(key, INPUT_DIM, HIDDEN_DIM, OUTPUT_DIM, LAYERS)

    prepared = prepare_params(params, HIDDEN_DIM, OUTPUT_DIM, LAYERS)

    out = lstm_base_forward(
        x, prepared, hidden_dim=HIDDEN_DIM, output_dim=OUTPUT_DIM,
        layers=LAYERS)
    out = jax.block_until_ready(out)

    ref = _reference_forward(x, params, HIDDEN_DIM, OUTPUT_DIM, LAYERS)
    np.testing.assert_allclose(np.asarray(out), np.asarray(ref),
                               atol=1e-4, rtol=1e-4)

    assert out.shape == (B, T, OUTPUT_DIM)
    print("KERNEL_OK")
</pallas_src>

<mosaic_0001>
module attributes {stable_mosaic.version = 11 : i64} {
  func.func @kernel(%arg0: memref<64x8xf32, #tpu.memory_space<vmem>>, %arg1: memref<8x128xf32, #tpu.memory_space<vmem>>, %arg2: memref<32x128xf32, #tpu.memory_space<vmem>>, %arg3: memref<1x128xf32, #tpu.memory_space<vmem>>, %arg4: memref<32x128xf32, #tpu.memory_space<vmem>>, %arg5: memref<32x128xf32, #tpu.memory_space<vmem>>, %arg6: memref<1x128xf32, #tpu.memory_space<vmem>>, %arg7: memref<32x128xf32, #tpu.memory_space<vmem>>, %arg8: memref<1x128xf32, #tpu.memory_space<vmem>>, %arg9: memref<64x128xf32, #tpu.memory_space<vmem>>, %arg10: memref<64x32xf32, #tpu.memory_space<vmem>>) attributes {dimension_semantics = [], scalar_prefetch = 0 : i64, scratch_operands = 1 : i64, tpu.core_type = #tpu.core_type<tc>} {
    %0 = tpu.iota {dimensions = array<i32: 1>} : vector<8x128xi32>
    %c64_i32 = arith.constant 64 : i32
    %1 = vector.broadcast %c64_i32 : i32 to vector<8x128xi32>
    %2 = arith.cmpi sge, %0, %1 : vector<8x128xi32>
    %c96_i32 = arith.constant 96 : i32
    %3 = vector.broadcast %c96_i32 : i32 to vector<8x128xi32>
    %4 = arith.cmpi slt, %0, %3 : vector<8x128xi32>
    %5 = arith.andi %2, %4 : vector<8x128xi1>
    %cst = arith.constant 1.000000e+00 : f32
    %cst_0 = arith.constant 5.000000e-01 : f32
    %6 = vector.broadcast %cst : f32 to vector<8x128xf32>
    %7 = vector.broadcast %cst_0 : f32 to vector<8x128xf32>
    %8 = arith.select %5, %6, %7 : vector<8x128xi1>, vector<8x128xf32>
    %cst_1 = arith.constant 0.000000e+00 : f32
    %cst_2 = arith.constant 5.000000e-01 : f32
    %9 = vector.broadcast %cst_1 : f32 to vector<8x128xf32>
    %10 = vector.broadcast %cst_2 : f32 to vector<8x128xf32>
    %11 = arith.select %5, %9, %10 : vector<8x128xi1>, vector<8x128xf32>
    %c0 = arith.constant 0 : index
    %c0_3 = arith.constant 0 : index
    %12 = vector.load %arg0[%c0, %c0_3] : memref<64x8xf32, #tpu.memory_space<vmem>>, vector<64x8xf32>
    %c0_4 = arith.constant 0 : index
    %c0_5 = arith.constant 0 : index
    %13 = vector.load %arg1[%c0_4, %c0_5] : memref<8x128xf32, #tpu.memory_space<vmem>>, vector<8x128xf32>
    %cst_6 = arith.constant dense<0.000000e+00> : vector<64x128xf32>
    %14 = tpu.matmul %12, %13, %cst_6 {dimension_numbers = #tpu.dot_dimension_numbers<[1], [0], [0], [1], [0, 0, 1, 1], [], []>} : vector<64x8xf32>, vector<8x128xf32>, vector<64x128xf32> -> vector<64x128xf32>
    %c0_7 = arith.constant 0 : index
    %c0_8 = arith.constant 0 : index
    %15 = vector.load %arg3[%c0_7, %c0_8] : memref<1x128xf32, #tpu.memory_space<vmem>>, vector<1x128xf32>
    %16 = vector.broadcast %15 : vector<1x128xf32> to vector<64x128xf32>
    %17 = arith.addf %14, %16 : vector<64x128xf32>
    %c0_9 = arith.constant 0 : index
    %c0_10 = arith.constant 0 : index
    %18 = vector.load %arg2[%c0_9, %c0_10] : memref<32x128xf32, #tpu.memory_space<vmem>>, vector<32x128xf32>
    %cst_11 = arith.constant 0.000000e+00 : f32
    %19 = vector.broadcast %cst_11 : f32 to vector<8x32xf32>
    %cst_12 = arith.constant 0.000000e+00 : f32
    %20 = vector.broadcast %cst_12 : f32 to vector<8x32xf32>
    %21 = vector.extract_strided_slice %17 {offsets = [0, 0], sizes = [8, 128], strides = [1, 1]} : vector<64x128xf32> to vector<8x128xf32>
    %cst_13 = arith.constant dense<0.000000e+00> : vector<8x128xf32>
    %22 = tpu.matmul %19, %18, %cst_13 {dimension_numbers = #tpu.dot_dimension_numbers<[1], [0], [0], [1], [0, 0, 1, 1], [], []>} : vector<8x32xf32>, vector<32x128xf32>, vector<8x128xf32> -> vector<8x128xf32>
    %23 = arith.addf %21, %22 : vector<8x128xf32>
    %24 = math.tanh %23 : vector<8x128xf32>
    %25 = arith.mulf %24, %8 : vector<8x128xf32>
    %26 = arith.addf %25, %11 : vector<8x128xf32>
    %27 = vector.extract_strided_slice %26 {offsets = [0, 0], sizes = [8, 32], strides = [1, 1]} : vector<8x128xf32> to vector<8x32xf32>
    %28 = vector.extract_strided_slice %26 {offsets = [0, 32], sizes = [8, 32], strides = [1, 1]} : vector<8x128xf32> to vector<8x32xf32>
    %29 = vector.extract_strided_slice %26 {offsets = [0, 64], sizes = [8, 32], strides = [1, 1]} : vector<8x128xf32> to vector<8x32xf32>
    %30 = vector.extract_strided_slice %26 {offsets = [0, 96], sizes = [8, 32], strides = [1, 1]} : vector<8x128xf32> to vector<8x32xf32>
    %31 = arith.mulf %28, %20 : vector<8x32xf32>
    %32 = arith.mulf %27, %29 : vector<8x32xf32>
    %33 = arith.addf %31, %32 : vector<8x32xf32>
    %34 = math.tanh %33 : vector<8x32xf32>
    %35 = arith.mulf %30, %34 : vector<8x32xf32>
    %c0_14 = arith.constant 0 : index
    %c0_15 = arith.constant 0 : index
    %36 = vector.load %arg10[%c0_14, %c0_15] : memref<64x32xf32, #tpu.memory_space<vmem>>, vector<8x32xf32>
    tpu.vector_store %arg10[%c0_14, %c0_15], %35 {strides = array<i32>} : memref<64x32xf32, #tpu.memory_space<vmem>>, vector<8x32xf32>,
    %37 = vector.extract_strided_slice %17 {offsets = [8, 0], sizes = [8, 128], strides = [1, 1]} : vector<64x128xf32> to vector<8x128xf32>
    %cst_16 = arith.constant dense<0.000000e+00> : vector<8x128xf32>
    %38 = tpu.matmul %35, %18, %cst_16 {dimension_numbers = #tpu.dot_dimension_numbers<[1], [0], [0], [1], [0, 0, 1, 1], [], []>} : vector<8x32xf32>, vector<32x128xf32>, vector<8x128xf32> -> vector<8x128xf32>
    %39 = arith.addf %37, %38 : vector<8x128xf32>
    %40 = math.tanh %39 : vector<8x128xf32>
    %41 = arith.mulf %40, %8 : vector<8x128xf32>
    %42 = arith.addf %41, %11 : vector<8x128xf32>
    %43 = vector.extract_strided_slice %42 {offsets = [0, 0], sizes = [8, 32], strides = [1, 1]} : vector<8x128xf32> to vector<8x32xf32>
    %44 = vector.extract_strided_slice %42 {offsets = [0, 32], sizes = [8, 32], strides = [1, 1]} : vector<8x128xf32> to vector<8x32xf32>
    %45 = vector.extract_strided_slice %42 {offsets = [0, 64], sizes = [8, 32], strides = [1, 1]} : vector<8x128xf32> to vector<8x32xf32>
    %46 = vector.extract_strided_slice %42 {offsets = [0, 96], sizes = [8, 32], strides = [1, 1]} : vector<8x128xf32> to vector<8x32xf32>
    %47 = arith.mulf %44, %33 : vector<8x32xf32>
    %48 = arith.mulf %43, %45 : vector<8x32xf32>
    %49 = arith.addf %47, %48 : vector<8x32xf32>
    %50 = math.tanh %49 : vector<8x32xf32>
    %51 = arith.mulf %46, %50 : vector<8x32xf32>
    %c8 = arith.constant 8 : index
    %c0_17 = arith.constant 0 : index
    %52 = vector.load %arg10[%c8, %c0_17] : memref<64x32xf32, #tpu.memory_space<vmem>>, vector<8x32xf32>
    tpu.vector_store %arg10[%c8, %c0_17], %51 {strides = array<i32>} : memref<64x32xf32, #tpu.memory_space<vmem>>, vector<8x32xf32>,
    %53 = vector.extract_strided_slice %17 {offsets = [16, 0], sizes = [8, 128], strides = [1, 1]} : vector<64x128xf32> to vector<8x128xf32>
    %cst_18 = arith.constant dense<0.000000e+00> : vector<8x128xf32>
    %54 = tpu.matmul %51, %18, %cst_18 {dimension_numbers = #tpu.dot_dimension_numbers<[1], [0], [0], [1], [0, 0, 1, 1], [], []>} : vector<8x32xf32>, vector<32x128xf32>, vector<8x128xf32> -> vector<8x128xf32>
    %55 = arith.addf %53, %54 : vector<8x128xf32>
    %56 = math.tanh %55 : vector<8x128xf32>
    %57 = arith.mulf %56, %8 : vector<8x128xf32>
    %58 = arith.addf %57, %11 : vector<8x128xf32>
    %59 = vector.extract_strided_slice %58 {offsets = [0, 0], sizes = [8, 32], strides = [1, 1]} : vector<8x128xf32> to vector<8x32xf32>
    %60 = vector.extract_strided_slice %58 {offsets = [0, 32], sizes = [8, 32], strides = [1, 1]} : vector<8x128xf32> to vector<8x32xf32>
    %61 = vector.extract_strided_slice %58 {offsets = [0, 64], sizes = [8, 32], strides = [1, 1]} : vector<8x128xf32> to vector<8x32xf32>
    %62 = vector.extract_strided_slice %58 {offsets = [0, 96], sizes = [8, 32], strides = [1, 1]} : vector<8x128xf32> to vector<8x32xf32>
    %63 = arith.mulf %60, %49 : vector<8x32xf32>
    %64 = arith.mulf %59, %61 : vector<8x32xf32>
    %65 = arith.addf %63, %64 : vector<8x32xf32>
    %66 = math.tanh %65 : vector<8x32xf32>
    %67 = arith.mulf %62, %66 : vector<8x32xf32>
    %c16 = arith.constant 16 : index
    %c0_19 = arith.constant 0 : index
    %68 = vector.load %arg10[%c16, %c0_19] : memref<64x32xf32, #tpu.memory_space<vmem>>, vector<8x32xf32>
    tpu.vector_store %arg10[%c16, %c0_19], %67 {strides = array<i32>} : memref<64x32xf32, #tpu.memory_space<vmem>>, vector<8x32xf32>,
    %69 = vector.extract_strided_slice %17 {offsets = [24, 0], sizes = [8, 128], strides = [1, 1]} : vector<64x128xf32> to vector<8x128xf32>
    %cst_20 = arith.constant dense<0.000000e+00> : vector<8x128xf32>
    %70 = tpu.matmul %67, %18, %cst_20 {dimension_numbers = #tpu.dot_dimension_numbers<[1], [0], [0], [1], [0, 0, 1, 1], [], []>} : vector<8x32xf32>, vector<32x128xf32>, vector<8x128xf32> -> vector<8x128xf32>
    %71 = arith.addf %69, %70 : vector<8x128xf32>
    %72 = math.tanh %71 : vector<8x128xf32>
    %73 = arith.mulf %72, %8 : vector<8x128xf32>
    %74 = arith.addf %73, %11 : vector<8x128xf32>
    %75 = vector.extract_strided_slice %74 {offsets = [0, 0], sizes = [8, 32], strides = [1, 1]} : vector<8x128xf32> to vector<8x32xf32>
    %76 = vector.extract_strided_slice %74 {offsets = [0, 32], sizes = [8, 32], strides = [1, 1]} : vector<8x128xf32> to vector<8x32xf32>
    %77 = vector.extract_strided_slice %74 {offsets = [0, 64], sizes = [8, 32], strides = [1, 1]} : vector<8x128xf32> to vector<8x32xf32>
    %78 = vector.extract_strided_slice %74 {offsets = [0, 96], sizes = [8, 32], strides = [1, 1]} : vector<8x128xf32> to vector<8x32xf32>
    %79 = arith.mulf %76, %65 : vector<8x32xf32>
    %80 = arith.mulf %75, %77 : vector<8x32xf32>
    %81 = arith.addf %79, %80 : vector<8x32xf32>
    %82 = math.tanh %81 : vector<8x32xf32>
    %83 = arith.mulf %78, %82 : vector<8x32xf32>
    %c24 = arith.constant 24 : index
    %c0_21 = arith.constant 0 : index
    %84 = vector.load %arg10[%c24, %c0_21] : memref<64x32xf32, #tpu.memory_space<vmem>>, vector<8x32xf32>
    tpu.vector_store %arg10[%c24, %c0_21], %83 {strides = array<i32>} : memref<64x32xf32, #tpu.memory_space<vmem>>, vector<8x32xf32>,
    %85 = vector.extract_strided_slice %17 {offsets = [32, 0], sizes = [8, 128], strides = [1, 1]} : vector<64x128xf32> to vector<8x128xf32>
    %cst_22 = arith.constant dense<0.000000e+00> : vector<8x128xf32>
    %86 = tpu.matmul %83, %18, %cst_22 {dimension_numbers = #tpu.dot_dimension_numbers<[1], [0], [0], [1], [0, 0, 1, 1], [], []>} : vector<8x32xf32>, vector<32x128xf32>, vector<8x128xf32> -> vector<8x128xf32>
    %87 = arith.addf %85, %86 : vector<8x128xf32>
    %88 = math.tanh %87 : vector<8x128xf32>
    %89 = arith.mulf %88, %8 : vector<8x128xf32>
    %90 = arith.addf %89, %11 : vector<8x128xf32>
    %91 = vector.extract_strided_slice %90 {offsets = [0, 0], sizes = [8, 32], strides = [1, 1]} : vector<8x128xf32> to vector<8x32xf32>
    %92 = vector.extract_strided_slice %90 {offsets = [0, 32], sizes = [8, 32], strides = [1, 1]} : vector<8x128xf32> to vector<8x32xf32>
    %93 = vector.extract_strided_slice %90 {offsets = [0, 64], sizes = [8, 32], strides = [1, 1]} : vector<8x128xf32> to vector<8x32xf32>
    %94 = vector.extract_strided_slice %90 {offsets = [0, 96], sizes = [8, 32], strides = [1, 1]} : vector<8x128xf32> to vector<8x32xf32>
    %95 = arith.mulf %92, %81 : vector<8x32xf32>
    %96 = arith.mulf %91, %93 : vector<8x32xf32>
    %97 = arith.addf %95, %96 : vector<8x32xf32>
    %98 = math.tanh %97 : vector<8x32xf32>
    %99 = arith.mulf %94, %98 : vector<8x32xf32>
    %c32 = arith.constant 32 : index
    %c0_23 = arith.constant 0 : index
    %100 = vector.load %arg10[%c32, %c0_23] : memref<64x32xf32, #tpu.memory_space<vmem>>, vector<8x32xf32>
    tpu.vector_store %arg10[%c32, %c0_23], %99 {strides = array<i32>} : memref<64x32xf32, #tpu.memory_space<vmem>>, vector<8x32xf32>,
    %101 = vector.extract_strided_slice %17 {offsets = [40, 0], sizes = [8, 128], strides = [1, 1]} : vector<64x128xf32> to vector<8x128xf32>
    %cst_24 = arith.constant dense<0.000000e+00> : vector<8x128xf32>
    %102 = tpu.matmul %99, %18, %cst_24 {dimension_numbers = #tpu.dot_dimension_numbers<[1], [0], [0], [1], [0, 0, 1, 1], [], []>} : vector<8x32xf32>, vector<32x128xf32>, vector<8x128xf32> -> vector<8x128xf32>
    %103 = arith.addf %101, %102 : vector<8x128xf32>
    %104 = math.tanh %103 : vector<8x128xf32>
    %105 = arith.mulf %104, %8 : vector<8x128xf32>
    %106 = arith.addf %105, %11 : vector<8x128xf32>
    %107 = vector.extract_strided_slice %106 {offsets = [0, 0], sizes = [8, 32], strides = [1, 1]} : vector<8x128xf32> to vector<8x32xf32>
    %108 = vector.extract_strided_slice %106 {offsets = [0, 32], sizes = [8, 32], strides = [1, 1]} : vector<8x128xf32> to vector<8x32xf32>
    %109 = vector.extract_strided_slice %106 {offsets = [0, 64], sizes = [8, 32], strides = [1, 1]} : vector<8x128xf32> to vector<8x32xf32>
    %110 = vector.extract_strided_slice %106 {offsets = [0, 96], sizes = [8, 32], strides = [1, 1]} : vector<8x128xf32> to vector<8x32xf32>
    %111 = arith.mulf %108, %97 : vector<8x32xf32>
    %112 = arith.mulf %107, %109 : vector<8x32xf32>
    %113 = arith.addf %111, %112 : vector<8x32xf32>
    %114 = math.tanh %113 : vector<8x32xf32>
    %115 = arith.mulf %110, %114 : vector<8x32xf32>
    %c40 = arith.constant 40 : index
    %c0_25 = arith.constant 0 : index
    %116 = vector.load %arg10[%c40, %c0_25] : memref<64x32xf32, #tpu.memory_space<vmem>>, vector<8x32xf32>
    tpu.vector_store %arg10[%c40, %c0_25], %115 {strides = array<i32>} : memref<64x32xf32, #tpu.memory_space<vmem>>, vector<8x32xf32>,
    %117 = vector.extract_strided_slice %17 {offsets = [48, 0], sizes = [8, 128], strides = [1, 1]} : vector<64x128xf32> to vector<8x128xf32>
    %cst_26 = arith.constant dense<0.000000e+00> : vector<8x128xf32>
    %118 = tpu.matmul %115, %18, %cst_26 {dimension_numbers = #tpu.dot_dimension_numbers<[1], [0], [0], [1], [0, 0, 1, 1], [], []>} : vector<8x32xf32>, vector<32x128xf32>, vector<8x128xf32> -> vector<8x128xf32>
    %119 = arith.addf %117, %118 : vector<8x128xf32>
    %120 = math.tanh %119 : vector<8x128xf32>
    %121 = arith.mulf %120, %8 : vector<8x128xf32>
    %122 = arith.addf %121, %11 : vector<8x128xf32>
    %123 = vector.extract_strided_slice %122 {offsets = [0, 0], sizes = [8, 32], strides = [1, 1]} : vector<8x128xf32> to vector<8x32xf32>
    %124 = vector.extract_strided_slice %122 {offsets = [0, 32], sizes = [8, 32], strides = [1, 1]} : vector<8x128xf32> to vector<8x32xf32>
    %125 = vector.extract_strided_slice %122 {offsets = [0, 64], sizes = [8, 32], strides = [1, 1]} : vector<8x128xf32> to vector<8x32xf32>
    %126 = vector.extract_strided_slice %122 {offsets = [0, 96], sizes = [8, 32], strides = [1, 1]} : vector<8x128xf32> to vector<8x32xf32>
    %127 = arith.mulf %124, %113 : vector<8x32xf32>
    %128 = arith.mulf %123, %125 : vector<8x32xf32>
    %129 = arith.addf %127, %128 : vector<8x32xf32>
    %130 = math.tanh %129 : vector<8x32xf32>
    %131 = arith.mulf %126, %130 : vector<8x32xf32>
    %c48 = arith.constant 48 : index
    %c0_27 = arith.constant 0 : index
    %132 = vector.load %arg10[%c48, %c0_27] : memref<64x32xf32, #tpu.memory_space<vmem>>, vector<8x32xf32>
    tpu.vector_store %arg10[%c48, %c0_27], %131 {strides = array<i32>} : memref<64x32xf32, #tpu.memory_space<vmem>>, vector<8x32xf32>,
    %133 = vector.extract_strided_slice %17 {offsets = [56, 0], sizes = [8, 128], strides = [1, 1]} : vector<64x128xf32> to vector<8x128xf32>
    %cst_28 = arith.constant dense<0.000000e+00> : vector<8x128xf32>
    %134 = tpu.matmul %131, %18, %cst_28 {dimension_numbers = #tpu.dot_dimension_numbers<[1], [0], [0], [1], [0, 0, 1, 1], [], []>} : vector<8x32xf32>, vector<32x128xf32>, vector<8x128xf32> -> vector<8x128xf32>
    %135 = arith.addf %133, %134 : vector<8x128xf32>
    %136 = math.tanh %135 : vector<8x128xf32>
    %137 = arith.mulf %136, %8 : vector<8x128xf32>
    %138 = arith.addf %137, %11 : vector<8x128xf32>
    %139 = vector.extract_strided_slice %138 {offsets = [0, 0], sizes = [8, 32], strides = [1, 1]} : vector<8x128xf32> to vector<8x32xf32>
    %140 = vector.extract_strided_slice %138 {offsets = [0, 32], sizes = [8, 32], strides = [1, 1]} : vector<8x128xf32> to vector<8x32xf32>
    %141 = vector.extract_strided_slice %138 {offsets = [0, 64], sizes = [8, 32], strides = [1, 1]} : vector<8x128xf32> to vector<8x32xf32>
    %142 = vector.extract_strided_slice %138 {offsets = [0, 96], sizes = [8, 32], strides = [1, 1]} : vector<8x128xf32> to vector<8x32xf32>
    %143 = arith.mulf %140, %129 : vector<8x32xf32>
    %144 = arith.mulf %139, %141 : vector<8x32xf32>
    %145 = arith.addf %143, %144 : vector<8x32xf32>
    %146 = math.tanh %145 : vector<8x32xf32>
    %147 = arith.mulf %142, %146 : vector<8x32xf32>
    %c56 = arith.constant 56 : index
    %c0_29 = arith.constant 0 : index
    %148 = vector.load %arg10[%c56, %c0_29] : memref<64x32xf32, #tpu.memory_space<vmem>>, vector<8x32xf32>
    tpu.vector_store %arg10[%c56, %c0_29], %147 {strides = array<i32>} : memref<64x32xf32, #tpu.memory_space<vmem>>, vector<8x32xf32>,
    %c0_30 = arith.constant 0 : index
    %c0_31 = arith.constant 0 : index
    %149 = vector.load %arg10[%c0_30, %c0_31] : memref<64x32xf32, #tpu.memory_space<vmem>>, vector<64x32xf32>
    %c0_32 = arith.constant 0 : index
    %c0_33 = arith.constant 0 : index
    %150 = vector.load %arg4[%c0_32, %c0_33] : memref<32x128xf32, #tpu.memory_space<vmem>>, vector<32x128xf32>
    %cst_34 = arith.constant dense<0.000000e+00> : vector<64x128xf32>
    %151 = tpu.matmul %149, %150, %cst_34 {dimension_numbers = #tpu.dot_dimension_numbers<[1], [0], [0], [1], [0, 0, 1, 1], [], []>} : vector<64x32xf32>, vector<32x128xf32>, vector<64x128xf32> -> vector<64x128xf32>
    %c0_35 = arith.constant 0 : index
    %c0_36 = arith.constant 0 : index
    %152 = vector.load %arg6[%c0_35, %c0_36] : memref<1x128xf32, #tpu.memory_space<vmem>>, vector<1x128xf32>
    %153 = vector.broadcast %152 : vector<1x128xf32> to vector<64x128xf32>
    %154 = arith.addf %151, %153 : vector<64x128xf32>
    %c0_37 = arith.constant 0 : index
    %c0_38 = arith.constant 0 : index
    %155 = vector.load %arg5[%c0_37, %c0_38] : memref<32x128xf32, #tpu.memory_space<vmem>>, vector<32x128xf32>
    %cst_39 = arith.constant 0.000000e+00 : f32
    %156 = vector.broadcast %cst_39 : f32 to vector<8x32xf32>
    %cst_40 = arith.constant 0.000000e+00 : f32
    %157 = vector.broadcast %cst_40 : f32 to vector<8x32xf32>
    %158 = vector.extract_strided_slice %154 {offsets = [0, 0], sizes = [8, 128], strides = [1, 1]} : vector<64x128xf32> to vector<8x128xf32>
    %cst_41 = arith.constant dense<0.000000e+00> : vector<8x128xf32>
    %159 = tpu.matmul %156, %155, %cst_41 {dimension_numbers = #tpu.dot_dimension_numbers<[1], [0], [0], [1], [0, 0, 1, 1], [], []>} : vector<8x32xf32>, vector<32x128xf32>, vector<8x128xf32> -> vector<8x128xf32>
    %160 = arith.addf %158, %159 : vector<8x128xf32>
    %161 = math.tanh %160 : vector<8x128xf32>
    %162 = arith.mulf %161, %8 : vector<8x128xf32>
    %163 = arith.addf %162, %11 : vector<8x128xf32>
    %164 = vector.extract_strided_slice %163 {offsets = [0, 0], sizes = [8, 32], strides = [1, 1]} : vector<8x128xf32> to vector<8x32xf32>
    %165 = vector.extract_strided_slice %163 {offsets = [0, 32], sizes = [8, 32], strides = [1, 1]} : vector<8x128xf32> to vector<8x32xf32>
    %166 = vector.extract_strided_slice %163 {offsets = [0, 64], sizes = [8, 32], strides = [1, 1]} : vector<8x128xf32> to vector<8x32xf32>
    %167 = vector.extract_strided_slice %163 {offsets = [0, 96], sizes = [8, 32], strides = [1, 1]} : vector<8x128xf32> to vector<8x32xf32>
    %168 = arith.mulf %165, %157 : vector<8x32xf32>
    %169 = arith.mulf %164, %166 : vector<8x32xf32>
    %170 = arith.addf %168, %169 : vector<8x32xf32>
    %171 = math.tanh %170 : vector<8x32xf32>
    %172 = arith.mulf %167, %171 : vector<8x32xf32>
    %c0_42 = arith.constant 0 : index
    %c0_43 = arith.constant 0 : index
    %173 = vector.load %arg10[%c0_42, %c0_43] : memref<64x32xf32, #tpu.memory_space<vmem>>, vector<8x32xf32>
    tpu.vector_store %arg10[%c0_42, %c0_43], %172 {strides = array<i32>} : memref<64x32xf32, #tpu.memory_space<vmem>>, vector<8x32xf32>,
    %174 = vector.extract_strided_slice %154 {offsets = [8, 0], sizes = [8, 128], strides = [1, 1]} : vector<64x128xf32> to vector<8x128xf32>
    %cst_44 = arith.constant dense<0.000000e+00> : vector<8x128xf32>
    %175 = tpu.matmul %172, %155, %cst_44 {dimension_numbers = #tpu.dot_dimension_numbers<[1], [0], [0], [1], [0, 0, 1, 1], [], []>} : vector<8x32xf32>, vector<32x128xf32>, vector<8x128xf32> -> vector<8x128xf32>
    %176 = arith.addf %174, %175 : vector<8x128xf32>
    %177 = math.tanh %176 : vector<8x128xf32>
    %178 = arith.mulf %177, %8 : vector<8x128xf32>
    %179 = arith.addf %178, %11 : vector<8x128xf32>
    %180 = vector.extract_strided_slice %179 {offsets = [0, 0], sizes = [8, 32], strides = [1, 1]} : vector<8x128xf32> to vector<8x32xf32>
    %181 = vector.extract_strided_slice %179 {offsets = [0, 32], sizes = [8, 32], strides = [1, 1]} : vector<8x128xf32> to vector<8x32xf32>
    %182 = vector.extract_strided_slice %179 {offsets = [0, 64], sizes = [8, 32], strides = [1, 1]} : vector<8x128xf32> to vector<8x32xf32>
    %183 = vector.extract_strided_slice %179 {offsets = [0, 96], sizes = [8, 32], strides = [1, 1]} : vector<8x128xf32> to vector<8x32xf32>
    %184 = arith.mulf %181, %170 : vector<8x32xf32>
    %185 = arith.mulf %180, %182 : vector<8x32xf32>
    %186 = arith.addf %184, %185 : vector<8x32xf32>
    %187 = math.tanh %186 : vector<8x32xf32>
    %188 = arith.mulf %183, %187 : vector<8x32xf32>
    %c8_45 = arith.constant 8 : index
    %c0_46 = arith.constant 0 : index
    %189 = vector.load %arg10[%c8_45, %c0_46] : memref<64x32xf32, #tpu.memory_space<vmem>>, vector<8x32xf32>
    tpu.vector_store %arg10[%c8_45, %c0_46], %188 {strides = array<i32>} : memref<64x32xf32, #tpu.memory_space<vmem>>, vector<8x32xf32>,
    %190 = vector.extract_strided_slice %154 {offsets = [16, 0], sizes = [8, 128], strides = [1, 1]} : vector<64x128xf32> to vector<8x128xf32>
    %cst_47 = arith.constant dense<0.000000e+00> : vector<8x128xf32>
    %191 = tpu.matmul %188, %155, %cst_47 {dimension_numbers = #tpu.dot_dimension_numbers<[1], [0], [0], [1], [0, 0, 1, 1], [], []>} : vector<8x32xf32>, vector<32x128xf32>, vector<8x128xf32> -> vector<8x128xf32>
    %192 = arith.addf %190, %191 : vector<8x128xf32>
    %193 = math.tanh %192 : vector<8x128xf32>
    %194 = arith.mulf %193, %8 : vector<8x128xf32>
    %195 = arith.addf %194, %11 : vector<8x128xf32>
    %196 = vector.extract_strided_slice %195 {offsets = [0, 0], sizes = [8, 32], strides = [1, 1]} : vector<8x128xf32> to vector<8x32xf32>
    %197 = vector.extract_strided_slice %195 {offsets = [0, 32], sizes = [8, 32], strides = [1, 1]} : vector<8x128xf32> to vector<8x32xf32>
    %198 = vector.extract_strided_slice %195 {offsets = [0, 64], sizes = [8, 32], strides = [1, 1]} : vector<8x128xf32> to vector<8x32xf32>
    %199 = vector.extract_strided_slice %195 {offsets = [0, 96], sizes = [8, 32], strides = [1, 1]} : vector<8x128xf32> to vector<8x32xf32>
    %200 = arith.mulf %197, %186 : vector<8x32xf32>
    %201 = arith.mulf %196, %198 : vector<8x32xf32>
    %202 = arith.addf %200, %201 : vector<8x32xf32>
    %203 = math.tanh %202 : vector<8x32xf32>
    %204 = arith.mulf %199, %203 : vector<8x32xf32>
    %c16_48 = arith.constant 16 : index
    %c0_49 = arith.constant 0 : index
    %205 = vector.load %arg10[%c16_48, %c0_49] : memref<64x32xf32, #tpu.memory_space<vmem>>, vector<8x32xf32>
    tpu.vector_store %arg10[%c16_48, %c0_49], %204 {strides = array<i32>} : memref<64x32xf32, #tpu.memory_space<vmem>>, vector<8x32xf32>,
    %206 = vector.extract_strided_slice %154 {offsets = [24, 0], sizes = [8, 128], strides = [1, 1]} : vector<64x128xf32> to vector<8x128xf32>
    %cst_50 = arith.constant dense<0.000000e+00> : vector<8x128xf32>
    %207 = tpu.matmul %204, %155, %cst_50 {dimension_numbers = #tpu.dot_dimension_numbers<[1], [0], [0], [1], [0, 0, 1, 1], [], []>} : vector<8x32xf32>, vector<32x128xf32>, vector<8x128xf32> -> vector<8x128xf32>
    %208 = arith.addf %206, %207 : vector<8x128xf32>
    %209 = math.tanh %208 : vector<8x128xf32>
    %210 = arith.mulf %209, %8 : vector<8x128xf32>
    %211 = arith.addf %210, %11 : vector<8x128xf32>
    %212 = vector.extract_strided_slice %211 {offsets = [0, 0], sizes = [8, 32], strides = [1, 1]} : vector<8x128xf32> to vector<8x32xf32>
    %213 = vector.extract_strided_slice %211 {offsets = [0, 32], sizes = [8, 32], strides = [1, 1]} : vector<8x128xf32> to vector<8x32xf32>
    %214 = vector.extract_strided_slice %211 {offsets = [0, 64], sizes = [8, 32], strides = [1, 1]} : vector<8x128xf32> to vector<8x32xf32>
    %215 = vector.extract_strided_slice %211 {offsets = [0, 96], sizes = [8, 32], strides = [1, 1]} : vector<8x128xf32> to vector<8x32xf32>
    %216 = arith.mulf %213, %202 : vector<8x32xf32>
    %217 = arith.mulf %212, %214 : vector<8x32xf32>
    %218 = arith.addf %216, %217 : vector<8x32xf32>
    %219 = math.tanh %218 : vector<8x32xf32>
    %220 = arith.mulf %215, %219 : vector<8x32xf32>
    %c24_51 = arith.constant 24 : index
    %c0_52 = arith.constant 0 : index
    %221 = vector.load %arg10[%c24_51, %c0_52] : memref<64x32xf32, #tpu.memory_space<vmem>>, vector<8x32xf32>
    tpu.vector_store %arg10[%c24_51, %c0_52], %220 {strides = array<i32>} : memref<64x32xf32, #tpu.memory_space<vmem>>, vector<8x32xf32>,
    %222 = vector.extract_strided_slice %154 {offsets = [32, 0], sizes = [8, 128], strides = [1, 1]} : vector<64x128xf32> to vector<8x128xf32>
    %cst_53 = arith.constant dense<0.000000e+00> : vector<8x128xf32>
    %223 = tpu.matmul %220, %155, %cst_53 {dimension_numbers = #tpu.dot_dimension_numbers<[1], [0], [0], [1], [0, 0, 1, 1], [], []>} : vector<8x32xf32>, vector<32x128xf32>, vector<8x128xf32> -> vector<8x128xf32>
    %224 = arith.addf %222, %223 : vector<8x128xf32>
    %225 = math.tanh %224 : vector<8x128xf32>
    %226 = arith.mulf %225, %8 : vector<8x128xf32>
    %227 = arith.addf %226, %11 : vector<8x128xf32>
    %228 = vector.extract_strided_slice %227 {offsets = [0, 0], sizes = [8, 32], strides = [1, 1]} : vector<8x128xf32> to vector<8x32xf32>
    %229 = vector.extract_strided_slice %227 {offsets = [0, 32], sizes = [8, 32], strides = [1, 1]} : vector<8x128xf32> to vector<8x32xf32>
    %230 = vector.extract_strided_slice %227 {offsets = [0, 64], sizes = [8, 32], strides = [1, 1]} : vector<8x128xf32> to vector<8x32xf32>
    %231 = vector.extract_strided_slice %227 {offsets = [0, 96], sizes = [8, 32], strides = [1, 1]} : vector<8x128xf32> to vector<8x32xf32>
    %232 = arith.mulf %229, %218 : vector<8x32xf32>
    %233 = arith.mulf %228, %230 : vector<8x32xf32>
    %234 = arith.addf %232, %233 : vector<8x32xf32>
    %235 = math.tanh %234 : vector<8x32xf32>
    %236 = arith.mulf %231, %235 : vector<8x32xf32>
    %c32_54 = arith.constant 32 : index
    %c0_55 = arith.constant 0 : index
    %237 = vector.load %arg10[%c32_54, %c0_55] : memref<64x32xf32, #tpu.memory_space<vmem>>, vector<8x32xf32>
    tpu.vector_store %arg10[%c32_54, %c0_55], %236 {strides = array<i32>} : memref<64x32xf32, #tpu.memory_space<vmem>>, vector<8x32xf32>,
    %238 = vector.extract_strided_slice %154 {offsets = [40, 0], sizes = [8, 128], strides = [1, 1]} : vector<64x128xf32> to vector<8x128xf32>
    %cst_56 = arith.constant dense<0.000000e+00> : vector<8x128xf32>
    %239 = tpu.matmul %236, %155, %cst_56 {dimension_numbers = #tpu.dot_dimension_numbers<[1], [0], [0], [1], [0, 0, 1, 1], [], []>} : vector<8x32xf32>, vector<32x128xf32>, vector<8x128xf32> -> vector<8x128xf32>
    %240 = arith.addf %238, %239 : vector<8x128xf32>
    %241 = math.tanh %240 : vector<8x128xf32>
    %242 = arith.mulf %241, %8 : vector<8x128xf32>
    %243 = arith.addf %242, %11 : vector<8x128xf32>
    %244 = vector.extract_strided_slice %243 {offsets = [0, 0], sizes = [8, 32], strides = [1, 1]} : vector<8x128xf32> to vector<8x32xf32>
    %245 = vector.extract_strided_slice %243 {offsets = [0, 32], sizes = [8, 32], strides = [1, 1]} : vector<8x128xf32> to vector<8x32xf32>
    %246 = vector.extract_strided_slice %243 {offsets = [0, 64], sizes = [8, 32], strides = [1, 1]} : vector<8x128xf32> to vector<8x32xf32>
    %247 = vector.extract_strided_slice %243 {offsets = [0, 96], sizes = [8, 32], strides = [1, 1]} : vector<8x128xf32> to vector<8x32xf32>
    %248 = arith.mulf %245, %234 : vector<8x32xf32>
    %249 = arith.mulf %244, %246 : vector<8x32xf32>
    %250 = arith.addf %248, %249 : vector<8x32xf32>
    %251 = math.tanh %250 : vector<8x32xf32>
    %252 = arith.mulf %247, %251 : vector<8x32xf32>
    %c40_57 = arith.constant 40 : index
    %c0_58 = arith.constant 0 : index
    %253 = vector.load %arg10[%c40_57, %c0_58] : memref<64x32xf32, #tpu.memory_space<vmem>>, vector<8x32xf32>
    tpu.vector_store %arg10[%c40_57, %c0_58], %252 {strides = array<i32>} : memref<64x32xf32, #tpu.memory_space<vmem>>, vector<8x32xf32>,
    %254 = vector.extract_strided_slice %154 {offsets = [48, 0], sizes = [8, 128], strides = [1, 1]} : vector<64x128xf32> to vector<8x128xf32>
    %cst_59 = arith.constant dense<0.000000e+00> : vector<8x128xf32>
    %255 = tpu.matmul %252, %155, %cst_59 {dimension_numbers = #tpu.dot_dimension_numbers<[1], [0], [0], [1], [0, 0, 1, 1], [], []>} : vector<8x32xf32>, vector<32x128xf32>, vector<8x128xf32> -> vector<8x128xf32>
    %256 = arith.addf %254, %255 : vector<8x128xf32>
    %257 = math.tanh %256 : vector<8x128xf32>
    %258 = arith.mulf %257, %8 : vector<8x128xf32>
    %259 = arith.addf %258, %11 : vector<8x128xf32>
    %260 = vector.extract_strided_slice %259 {offsets = [0, 0], sizes = [8, 32], strides = [1, 1]} : vector<8x128xf32> to vector<8x32xf32>
    %261 = vector.extract_strided_slice %259 {offsets = [0, 32], sizes = [8, 32], strides = [1, 1]} : vector<8x128xf32> to vector<8x32xf32>
    %262 = vector.extract_strided_slice %259 {offsets = [0, 64], sizes = [8, 32], strides = [1, 1]} : vector<8x128xf32> to vector<8x32xf32>
    %263 = vector.extract_strided_slice %259 {offsets = [0, 96], sizes = [8, 32], strides = [1, 1]} : vector<8x128xf32> to vector<8x32xf32>
    %264 = arith.mulf %261, %250 : vector<8x32xf32>
    %265 = arith.mulf %260, %262 : vector<8x32xf32>
    %266 = arith.addf %264, %265 : vector<8x32xf32>
    %267 = math.tanh %266 : vector<8x32xf32>
    %268 = arith.mulf %263, %267 : vector<8x32xf32>
    %c48_60 = arith.constant 48 : index
    %c0_61 = arith.constant 0 : index
    %269 = vector.load %arg10[%c48_60, %c0_61] : memref<64x32xf32, #tpu.memory_space<vmem>>, vector<8x32xf32>
    tpu.vector_store %arg10[%c48_60, %c0_61], %268 {strides = array<i32>} : memref<64x32xf32, #tpu.memory_space<vmem>>, vector<8x32xf32>,
    %270 = vector.extract_strided_slice %154 {offsets = [56, 0], sizes = [8, 128], strides = [1, 1]} : vector<64x128xf32> to vector<8x128xf32>
    %cst_62 = arith.constant dense<0.000000e+00> : vector<8x128xf32>
    %271 = tpu.matmul %268, %155, %cst_62 {dimension_numbers = #tpu.dot_dimension_numbers<[1], [0], [0], [1], [0, 0, 1, 1], [], []>} : vector<8x32xf32>, vector<32x128xf32>, vector<8x128xf32> -> vector<8x128xf32>
    %272 = arith.addf %270, %271 : vector<8x128xf32>
    %273 = math.tanh %272 : vector<8x128xf32>
    %274 = arith.mulf %273, %8 : vector<8x128xf32>
    %275 = arith.addf %274, %11 : vector<8x128xf32>
    %276 = vector.extract_strided_slice %275 {offsets = [0, 0], sizes = [8, 32], strides = [1, 1]} : vector<8x128xf32> to vector<8x32xf32>
    %277 = vector.extract_strided_slice %275 {offsets = [0, 32], sizes = [8, 32], strides = [1, 1]} : vector<8x128xf32> to vector<8x32xf32>
    %278 = vector.extract_strided_slice %275 {offsets = [0, 64], sizes = [8, 32], strides = [1, 1]} : vector<8x128xf32> to vector<8x32xf32>
    %279 = vector.extract_strided_slice %275 {offsets = [0, 96], sizes = [8, 32], strides = [1, 1]} : vector<8x128xf32> to vector<8x32xf32>
    %280 = arith.mulf %277, %266 : vector<8x32xf32>
    %281 = arith.mulf %276, %278 : vector<8x32xf32>
    %282 = arith.addf %280, %281 : vector<8x32xf32>
    %283 = math.tanh %282 : vector<8x32xf32>
    %284 = arith.mulf %279, %283 : vector<8x32xf32>
    %c56_63 = arith.constant 56 : index
    %c0_64 = arith.constant 0 : index
    %285 = vector.load %arg10[%c56_63, %c0_64] : memref<64x32xf32, #tpu.memory_space<vmem>>, vector<8x32xf32>
    tpu.vector_store %arg10[%c56_63, %c0_64], %284 {strides = array<i32>} : memref<64x32xf32, #tpu.memory_space<vmem>>, vector<8x32xf32>,
    %c0_65 = arith.constant 0 : index
    %c0_66 = arith.constant 0 : index
    %286 = vector.load %arg10[%c0_65, %c0_66] : memref<64x32xf32, #tpu.memory_space<vmem>>, vector<64x32xf32>
    %c0_67 = arith.constant 0 : index
    %c0_68 = arith.constant 0 : index
    %287 = vector.load %arg7[%c0_67, %c0_68] : memref<32x128xf32, #tpu.memory_space<vmem>>, vector<32x128xf32>
    %cst_69 = arith.constant dense<0.000000e+00> : vector<64x128xf32>
    %288 = tpu.matmul %286, %287, %cst_69 {dimension_numbers = #tpu.dot_dimension_numbers<[1], [0], [0], [1], [0, 0, 1, 1], [], []>} : vector<64x32xf32>, vector<32x128xf32>, vector<64x128xf32> -> vector<64x128xf32>
    %c0_70 = arith.constant 0 : index
    %c0_71 = arith.constant 0 : index
    %289 = vector.load %arg8[%c0_70, %c0_71] : memref<1x128xf32, #tpu.memory_space<vmem>>, vector<1x128xf32>
    %290 = vector.broadcast %289 : vector<1x128xf32> to vector<64x128xf32>
    %291 = arith.addf %288, %290 : vector<64x128xf32>
    %cst_72 = arith.constant 0.000000e+00 : f32
    %292 = vector.broadcast %cst_72 : f32 to vector<64x128xf32>
    %293 = arith.maximumf %291, %292 : vector<64x128xf32>
    %c0_73 = arith.constant 0 : index
    %c0_74 = arith.constant 0 : index
    %294 = vector.load %arg9[%c0_73, %c0_74] : memref<64x128xf32, #tpu.memory_space<vmem>>, vector<64x128xf32>
    tpu.vector_store %arg9[%c0_73, %c0_74], %293 {strides = array<i32>} : memref<64x128xf32, #tpu.memory_space<vmem>>, vector<64x128xf32>,
    return
  }
}

</mosaic_0001>

<bundles_post_ra>
// kernel: lstm_base_forward.1
= control target key start
LH: loop header
LB: loop body
LE: loop exit
PB: predicated region body
PF: predicated region fallthrough
CT: control target
= control target key end

     0   :  { %14 = vsyncpa [#allocation4], 0  ;;  %s1239_s12 = smov [#allocation3]   ;;  %s1240_s14 = smov 128   ;;  %s1688_s0 = inlined_call_operand.vmem [shape: f32[64,8], index: 0, kind: input, shape index: {}]   ;;  %s1689_s1 = inlined_call_operand.vmem [shape: f32[8,128], index: 1, kind: input, shape index: {}]   ;;  %s1690_s2 = inlined_call_operand.vmem [shape: f32[32,128], index: 2, kind: input, shape index: {}]   ;;  %s1691_s3 = inlined_call_operand.vmem [shape: f32[1,128], index: 3, kind: input, shape index: {}]   ;;  %s1692_s4 = inlined_call_operand.vmem [shape: f32[32,128], index: 4, kind: input, shape index: {}]   ;;  %s1693_s5 = inlined_call_operand.vmem [shape: f32[32,128], index: 5, kind: input, shape index: {}]   ;;  %s1694_s6 = inlined_call_operand.vmem [shape: f32[1,128], index: 6, kind: input, shape index: {}]   ;;  %s1695_s7 = inlined_call_operand.hbm [shape: f32[32,128], index: 7, kind: input, shape index: {}]   ;;  %s1696_s8 = inlined_call_operand.vmem [shape: f32[1,128], index: 8, kind: input, shape index: {}]   ;;  %s1697_s9 = inlined_call_operand.vmem [shape: f32[64,128], index: 9, kind: output, shape index: {}]  }
   0x1   :  { %s33_s11 = sshll.u32 %s1695_s7, 4  ;;  %s35_s13 = sshll.u32 %s1239_s12, 4  ;;  %s34_s11 = int_to_ptr.hbm [resolvable:$true] %s33_s11  ;;  %s36_s13 = int_to_ptr.vmem [resolvable:$true] %s35_s13 }
   0x2   :  { %s1241_s15 = smov 8  }
   0x3   :  { %41 = dma.hbm_to_vmem [thread:$0]  %s34_s11, 512, %s36_s13, [#allocation4], %s1240_s14, %s1240_s14, %s1241_s15  }
   0x4   :  { %1237 = dma.done.wait [#allocation4], 512  }
   0x5   :  { %1238 = vsyncadd [#allocation4], 4294966784  ;;  %vm68_vm0 = vcmask 64512   ;;  %v1302_v0 = vld [vmem:[%s1690_s2 + $0x18] sm:$0xff]  ;;  %v1307_v1 = vld [vmem:[%s1690_s2 + $0x10] sm:$0xff]  ;;  %v1242_v6 = vmov 0.0   ;;  %v48_v8 = vlaneseq }
   0x6   :  { %v63_v2 = vld [vmem:[%s1689_s1] sm:$0xff]  ;;  %154 = vmatpush.msra.mxu1 %v1302_v0  ;;  %v1319_v4 = vld [vmem:[%s1690_s2 + $0x8] sm:$0xff]  ;;  %202 = vmatpush.msra.mxu2 %v1302_v0  ;;  %v1243_v14 = vmov 0.5   ;;  %s1245_s27 = smov 32   ;;  %vm138_vm4 = vcmask 261120   ;;  %v57_v45 = vld [vmem:[%s1688_s0 + $0x10] sm:$0xff] }
   0x7   :  { %108 = vmatpush.msra.mxu0 %v63_v2  ;;  %v55_v3 = vld [vmem:[%s1688_s0] sm:$0xff]  ;;  %250 = vmatpush.msra.mxu3 %v1302_v0  ;;  %v49_v11 = vand.u32 127, %v48_v8  ;;  %v56_v28 = vld [vmem:[%s1688_s0 + $0x8] sm:$0xff]  ;;  %v58_v60 = vld [vmem:[%s1688_s0 + $0x18] sm:$0xff] }
   0x8   :  { %1093 = vmatmul.msk.f32.vlgmr.msra.gmra.mxu0 %vm68_vm0, %v55_v3  ;;  %155 = vmatpush.msra.mxu1 %v1307_v1  ;;  %v1328_v5 = vld [vmem:[%s1690_s2] sm:$0xff] }
   0x9   :  { %203 = vmatpush.msra.mxu2 %v1307_v1  ;;  %251 = vmatpush.msra.mxu3 %v1307_v1  ;;  %v1358_v7 = vld [vmem:[%s1691_s3] ss:$0 sm:$0xff]  ;;  %vm50_vm1 = vcmp.ge.s32.totalorder %v49_v11, 64  ;;  %vm51_vm2 = vcmp.lt.s32.totalorder %v49_v11, 96  ;;  %s1244_s3 = smov 64  }
   0xa   :  { %156 = vmatpush.msra.mxu1 %v1319_v4  ;;  %vm52_vm3 = vmand %vm50_vm1, %vm51_vm2 }
   0xb   :  { %204 = vmatpush.msra.mxu2 %v1319_v4  ;;  %252 = vmatpush.msra.mxu3 %v1319_v4  ;;  %v1361_v15 = vsel %vm52_vm3, 1.0, %v1243_v14  ;;  %v1363_v17 = vsel %vm52_vm3, 0.0, %v1243_v14 }
   0xc   :  { %157 = vmatpush.msra.mxu1 %v1328_v5 }
   0xd   :  { %158 = vmatmul.f32.vlgmr.msra.gmra.mxu1 %v1242_v6  ;;  %205 = vmatpush.msra.mxu2 %v1328_v5 }
   0xe   :  { %253 = vmatpush.msra.mxu3 %v1328_v5  ;;  %298 = vmatpush.msrb.mxu1 %v1302_v0 }
   0xf   :  { %346 = vmatpush.msrb.mxu2 %v1302_v0 }
  0x10   :  { %394 = vmatpush.msrb.mxu3 %v1302_v0  ;;  %299 = vmatpush.msrb.mxu1 %v1307_v1 }
  0x11   :  { %347 = vmatpush.msrb.mxu2 %v1307_v1  ;;  %1094 = vmatmul.msk.f32.gmra.mxu0 %vm68_vm0, %v56_v28 }
  0x12   :  { %395 = vmatpush.msrb.mxu3 %v1307_v1  ;;  %300 = vmatpush.msrb.mxu1 %v1319_v4 }
  0x13   :  { %348 = vmatpush.msrb.mxu2 %v1319_v4 }
  0x14   :  { %396 = vmatpush.msrb.mxu3 %v1319_v4  ;;  %301 = vmatpush.msrb.mxu1 %v1328_v5 }
  0x15   :  { %349 = vmatpush.msrb.mxu2 %v1328_v5 }
  0x16   :  { %397 = vmatpush.msrb.mxu3 %v1328_v5  ;;  %442 = vmatpush.msra.mxu1 %v1302_v0 }
  0x18   :  { %443 = vmatpush.msra.mxu1 %v1307_v1 }
  0x19   :  { %1095 = vmatmul.msk.f32.gmra.mxu0 %vm68_vm0, %v57_v45 }
  0x1a   :  { %444 = vmatpush.msra.mxu1 %v1319_v4 }
  0x1c   :  { %445 = vmatpush.msra.mxu1 %v1328_v5 }
  0x21   :  { %1096 = vmatmul.msk.f32.gmra.mxu0 %vm68_vm0, %v58_v60  ;;  %v61_v60 = vld [vmem:[%s1688_s0 + $0x30] sm:$0xff] }
  0x85   :  { %v110_v9 = vpop.f32.mrf.mxu0 }
  0x86   :  { %v111_v10 = vadd.f32 %v1358_v7, %v110_v9 }
  0x8a   :  { %v159_v12 = vpop.f32.mrf.mxu1 }
  0x8b   :  { %v162_v13 = vadd.f32 %v159_v12, %v111_v10 }
  0x8d   :  { %1149 = vtanh.f32 %v162_v13 }
  0x8e   :  { %v113_v30 = vpop.f32.mrf.mxu0 }
  0x8f   :  { %v114_v31 = vadd.f32 %v1358_v7, %v113_v30 }
  0x93   :  { %v1150_v16 = vpop.eup %1149 }
  0x94   :  { %v164_v18 = vmul.f32 %v1150_v16, %v1361_v15 }
  0x96   :  { %v165_v19 = vadd.f32 %v164_v18, %v1363_v17  ;;  %v116_v47 = vpop.f32.mrf.mxu0 }
  0x97   :  { %v117_v48 = vadd.f32 %v1358_v7, %v116_v47 }
  0x98   :  { %168 = vrot.lane.b32.xlu0 %v165_v19, %s1244_s3  ;;  %v166_v22 = vmul.f32 0.0, %v165_v19 }
 0x10a   :  { %v169_v20 = vpop.permute.xlu0 %168 }
 0x10b   :  { %v171_v21 = vmul.f32 %v169_v20, %v165_v19 }
 0x10d   :  { %173 = vrot.lane.b32.xlu0 %v171_v21, %s1245_s27 }
 0x17f   :  { %v174_v23 = vpop.permute.xlu0 %173 }
 0x180   :  { %v176_v24 = vadd.f32 %v174_v23, %v166_v22 }
 0x182   :  { %1151 = vtanh.f32 %v176_v24 }
 0x188   :  { %v1152_v25 = vpop.eup %1151 }
 0x189   :  { %179 = vrot.lane.b32.xlu1 %v1152_v25, %s1244_s3 }
 0x1fb   :  { %v180_v26 = vpop.permute.xlu1 %179 }
 0x1fc   :  { %v182_v27 = vmul.f32 %v180_v26, %v165_v19  ;;  %v59_v19 = vld [vmem:[%s1688_s0 + $0x20] sm:$0xff] }
 0x1fd   :  { %1097 = vmatmul.msk.f32.gmra.mxu0 %vm68_vm0, %v59_v19 }
 0x1fe   :  { %184 = vrot.lane.b32.xlu1 %v182_v27, %s1245_s27 }
 0x270   :  { %v185_v29 = vpop.permute.xlu1 %184 }
 0x271   :  { %187 = vst.msk [vmem:[#allocation2] sm:$0xff] %vm138_vm4, %v185_v29  ;;  %1101 = vmatmul.msk.f32.vlgmr.msra.gmra.mxu2 %vm138_vm4, %v185_v29 }
 0x272   :  { %490 = vmatpush.msra.mxu2 %v1302_v0  ;;  %v119_v0 = vpop.f32.mrf.mxu0 }
 0x274   :  { %491 = vmatpush.msra.mxu2 %v1307_v1  ;;  %v120_v1 = vadd.f32 %v1358_v7, %v119_v0  ;;  %v1469_v0 = vld [vmem:[%s1693_s5 + $0x10] sm:$0xff] }
 0x276   :  { %492 = vmatpush.msra.mxu2 %v1319_v4 }
 0x278   :  { %493 = vmatpush.msra.mxu2 %v1328_v5 }
 0x27a   :  { %v122_v21 = vpop.f32.mrf.mxu0 }
 0x27b   :  { %v123_v22 = vadd.f32 %v1358_v7, %v122_v21 }
 0x2f4   :  { %v207_v32 = vpop.f32.mrf.mxu2 }
 0x2f5   :  { %v210_v33 = vadd.f32 %v207_v32, %v114_v31 }
 0x2f7   :  { %1153 = vtanh.f32 %v210_v33 }
 0x2fd   :  { %v1154_v34 = vpop.eup %1153 }
 0x2fe   :  { %v212_v35 = vmul.f32 %v1154_v34, %v1361_v15 }
 0x300   :  { %v213_v36 = vadd.f32 %v212_v35, %v1363_v17 }
 0x302   :  { %216 = vrot.lane.b32.xlu2 %v213_v36, %s1244_s3  ;;  %v214_v39 = vmul.f32 %v213_v36, %v176_v24 }
 0x35c   :  { %v217_v37 = vpop.permute.xlu2 %216 }
 0x35d   :  { %v219_v38 = vmul.f32 %v217_v37, %v213_v36  ;;  %v534_v37 = vld [vmem:[%s1692_s4 + $0x10] sm:$0xff] }
 0x35f   :  { %221 = vrot.lane.b32.xlu2 %v219_v38, %s1245_s27  ;;  %v60_v38 = vld [vmem:[%s1688_s0 + $0x28] sm:$0xff] }
 0x360   :  { %1098 = vmatmul.msk.f32.gmra.mxu0 %vm68_vm0, %v60_v38 }
 0x368   :  { %1099 = vmatmul.msk.f32.gmra.mxu0 %vm68_vm0, %v61_v60 }
 0x3b9   :  { %v222_v40 = vpop.permute.xlu2 %221 }
 0x3ba   :  { %v224_v41 = vadd.f32 %v222_v40, %v214_v39  ;;  %v533_v39 = vld [vmem:[%s1692_s4 + $0x8] sm:$0xff]  ;;  %v532_v40 = vld [vmem:[%s1692_s4] sm:$0xff] }
 0x3bc   :  { %1155 = vtanh.f32 %v224_v41 }
 0x3c2   :  { %v1156_v42 = vpop.eup %1155 }
 0x3c3   :  { %227 = vrot.lane.b32.xlu0 %v1156_v42, %s1244_s3  ;;  %v524_v42 = vld [vmem:[#allocation2] sm:$0xff] }
 0x3dd   :  { %v125_v47 = vpop.f32.mrf.mxu0 }
 0x435   :  { %v228_v43 = vpop.permute.xlu0 %227 }
 0x436   :  { %v230_v44 = vmul.f32 %v228_v43, %v213_v36  ;;  %v535_v36 = vld [vmem:[%s1692_s4 + $0x18] sm:$0xff] }
 0x438   :  { %232 = vrot.lane.b32.xlu1 %v230_v44, %s1245_s27 }
 0x4aa   :  { %v233_v46 = vpop.permute.xlu1 %232 }
 0x4ab   :  { %235 = vst.msk [vmem:[#allocation2 + $0x8] sm:$0xff] %vm138_vm4, %v233_v46  ;;  %1102 = vmatmul.msk.f32.vlgmr.msra.gmra.mxu3 %vm138_vm4, %v233_v46 }
 0x4ac   :  { %576 = vmatpush.msra.mxu3 %v535_v36 }
 0x4ae   :  { %577 = vmatpush.msra.mxu3 %v534_v37 }
 0x4b0   :  { %578 = vmatpush.msra.mxu3 %v533_v39  ;;  %v62_v39 = vld [vmem:[%s1688_s0 + $0x38] sm:$0xff] }
 0x4b1   :  { %1100 = vmatmul.msk.f32.gmra.mxu0 %vm68_vm0, %v62_v39 }
 0x4b2   :  { %579 = vmatpush.msra.mxu3 %v532_v40  ;;  %v525_v43 = vld [vmem:[#allocation2 + $0x8] sm:$0xff]  ;;  %v1527_v40 = vld [vmem:[#allocation3 + $0x18] sm:$0xff] }
 0x4b3   :  { %1043 = vmatpush.msrb.mxu0 %v1527_v40 }
 0x52e   :  { %v255_v49 = vpop.f32.mrf.mxu3 }
 0x52f   :  { %v258_v50 = vadd.f32 %v255_v49, %v117_v48  ;;  %v126_v48 = vadd.f32 %v1358_v7, %v125_v47 }
 0x531   :  { %1157 = vtanh.f32 %v258_v50 }
 0x537   :  { %v1158_v51 = vpop.eup %1157 }
 0x538   :  { %v260_v52 = vmul.f32 %v1158_v51, %v1361_v15 }
 0x53a   :  { %v261_v53 = vadd.f32 %v260_v52, %v1363_v17 }
 0x53c   :  { %264 = vrot.lane.b32.xlu2 %v261_v53, %s1244_s3  ;;  %v262_v56 = vmul.f32 %v261_v53, %v224_v41 }
 0x596   :  { %v265_v54 = vpop.permute.xlu2 %264 }
 0x597   :  { %v267_v55 = vmul.f32 %v265_v54, %v261_v53 }
 0x599   :  { %269 = vrot.lane.b32.xlu0 %v267_v55, %s1245_s27 }
 0x60b   :  { %v270_v57 = vpop.permute.xlu0 %269 }
 0x60c   :  { %v272_v58 = vadd.f32 %v270_v57, %v262_v56 }
 0x60e   :  { %1159 = vtanh.f32 %v272_v58 }
 0x614   :  { %v1160_v59 = vpop.eup %1159 }
 0x615   :  { %275 = vrot.lane.b32.xlu1 %v1160_v59, %s1244_s3 }
 0x687   :  { %v276_v61 = vpop.permute.xlu1 %275 }
 0x688   :  { %v278_v62 = vmul.f32 %v276_v61, %v261_v53 }
 0x68a   :  { %280 = vrot.lane.b32.xlu2 %v278_v62, %s1245_s27 }
 0x6e4   :  { %v281_v63 = vpop.permute.xlu2 %280 }
 0x6e5   :  { %283 = vst.msk [vmem:[#allocation2 + $0x10] sm:$0xff] %vm138_vm4, %v281_v63  ;;  %1103 = vmatmul.msk.f32.vlgmr.msrb.gmra.mxu1 %vm138_vm4, %v281_v63  ;;  %v1464_v63 = vld [vmem:[%s1693_s5 + $0x18] sm:$0xff] }
 0x6e6   :  { %621 = vmatpush.msrb.mxu1 %v1464_v63 }
 0x6e8   :  { %622 = vmatpush.msrb.mxu1 %v1469_v0 }
 0x6ec   :  { %v526_v44 = vld [vmem:[#allocation2 + $0x10] sm:$0xff] }
 0x762   :  { %v303_v2 = vpop.f32.mrf.mxu1 }
 0x763   :  { %v306_v3 = vadd.f32 %v303_v2, %v120_v1  ;;  %v1476_v1 = vld [vmem:[%s1693_s5 + $0x8] sm:$0xff]  ;;  %v1483_v2 = vld [vmem:[%s1693_s5] sm:$0xff] }
 0x764   :  { %623 = vmatpush.msrb.mxu1 %v1476_v1 }
 0x765   :  { %1161 = vtanh.f32 %v306_v3 }
 0x766   :  { %624 = vmatpush.msrb.mxu1 %v1483_v2 }
 0x76b   :  { %v1162_v4 = vpop.eup %1161 }
 0x76c   :  { %v308_v5 = vmul.f32 %v1162_v4, %v1361_v15 }
 0x76e   :  { %v309_v8 = vadd.f32 %v308_v5, %v1363_v17  ;;  %v128_v5 = vpop.f32.mrf.mxu0 }
 0x770   :  { %312 = vrot.lane.b32.xlu0 %v309_v8, %s1244_s3  ;;  %v310_v11 = vmul.f32 %v309_v8, %v272_v58 }
 0x7e2   :  { %v313_v9 = vpop.permute.xlu0 %312 }
 0x7e3   :  { %v315_v10 = vmul.f32 %v313_v9, %v309_v8 }
 0x7e5   :  { %317 = vrot.lane.b32.xlu1 %v315_v10, %s1245_s27 }
 0x857   :  { %v318_v12 = vpop.permute.xlu1 %317 }
 0x858   :  { %v320_v13 = vadd.f32 %v318_v12, %v310_v11  ;;  %v1505_v11 = vld [vmem:[%s1694_s6] ss:$0 sm:$0xff] }
 0x85a   :  { %1163 = vtanh.f32 %v320_v13 }
 0x860   :  { %v1164_v14 = vpop.eup %1163 }
 0x861   :  { %323 = vrot.lane.b32.xlu2 %v1164_v14, %s1244_s3 }
 0x8bb   :  { %v324_v16 = vpop.permute.xlu2 %323 }
 0x8bc   :  { %v326_v18 = vmul.f32 %v324_v16, %v309_v8  ;;  %v129_v8 = vadd.f32 %v1358_v7, %v128_v5 }
 0x8be   :  { %328 = vrot.lane.b32.xlu0 %v326_v18, %s1245_s27 }
 0x930   :  { %v329_v20 = vpop.permute.xlu0 %328 }
 0x931   :  { %331 = vst.msk [vmem:[#allocation2 + $0x18] sm:$0xff] %vm138_vm4, %v329_v20  ;;  %1104 = vmatmul.msk.f32.vlgmr.msrb.gmra.mxu2 %vm138_vm4, %v329_v20 }
 0x932   :  { %669 = vmatpush.msrb.mxu2 %v1464_v63 }
 0x934   :  { %670 = vmatpush.msrb.mxu2 %v1469_v0 }
 0x936   :  { %671 = vmatpush.msrb.mxu2 %v1476_v1 }
 0x938   :  { %v527_v45 = vld [vmem:[#allocation2 + $0x18] sm:$0xff]  ;;  %672 = vmatpush.msrb.mxu2 %v1483_v2 }
 0x9b4   :  { %v351_v23 = vpop.f32.mrf.mxu2 }
 0x9b5   :  { %v354_v24 = vadd.f32 %v351_v23, %v123_v22 }
 0x9b7   :  { %1165 = vtanh.f32 %v354_v24 }
 0x9bd   :  { %v1166_v25 = vpop.eup %1165 }
 0x9be   :  { %v356_v26 = vmul.f32 %v1166_v25, %v1361_v15 }
 0x9c0   :  { %v357_v27 = vadd.f32 %v356_v26, %v1363_v17 }
 0x9c2   :  { %360 = vrot.lane.b32.xlu1 %v357_v27, %s1244_s3  ;;  %v358_v30 = vmul.f32 %v357_v27, %v320_v13 }
 0xa34   :  { %v361_v28 = vpop.permute.xlu1 %360 }
 0xa35   :  { %v363_v29 = vmul.f32 %v361_v28, %v357_v27 }
 0xa37   :  { %365 = vrot.lane.b32.xlu2 %v363_v29, %s1245_s27 }
 0xa91   :  { %v366_v31 = vpop.permute.xlu2 %365 }
 0xa92   :  { %v368_v32 = vadd.f32 %v366_v31, %v358_v30 }
 0xa94   :  { %1167 = vtanh.f32 %v368_v32 }
 0xa9a   :  { %v1168_v33 = vpop.eup %1167 }
 0xa9b   :  { %371 = vrot.lane.b32.xlu0 %v1168_v33, %s1244_s3 }
 0xb0d   :  { %v372_v34 = vpop.permute.xlu0 %371 }
 0xb0e   :  { %v374_v35 = vmul.f32 %v372_v34, %v357_v27 }
 0xb10   :  { %376 = vrot.lane.b32.xlu1 %v374_v35, %s1245_s27 }
 0xb82   :  { %v377_v41 = vpop.permute.xlu1 %376 }
 0xb83   :  { %379 = vst.msk [vmem:[#allocation2 + $0x20] sm:$0xff] %vm138_vm4, %v377_v41  ;;  %1105 = vmatmul.msk.f32.vlgmr.msrb.gmra.mxu3 %vm138_vm4, %v377_v41  ;;  %v1529_v41 = vld [vmem:[#allocation3 + $0x10] sm:$0xff] }
 0xb84   :  { %1044 = vmatpush.msrb.mxu0 %v1529_v41 }
 0xb8a   :  { %v528_v46 = vld [vmem:[#allocation2 + $0x20] sm:$0xff] }
 0xb8b   :  { %1108 = vmatmul.msk.f32.vlgmr.msra.gmra.mxu3 %vm138_vm4, %v524_v42  ;;  %v1532_v42 = vld [vmem:[#allocation3 + $0x8] sm:$0xff] }
 0xb8c   :  { %1045 = vmatpush.msrb.mxu0 %v1532_v42 }
 0xb93   :  { %1109 = vmatmul.msk.f32.gmra.mxu3 %vm138_vm4, %v525_v43  ;;  %v1535_v43 = vld [vmem:[#allocation3] sm:$0xff] }
 0xb94   :  { %1046 = vmatpush.msrb.mxu0 %v1535_v43 }
 0xb9b   :  { %1110 = vmatmul.msk.f32.gmra.mxu3 %vm138_vm4, %v526_v44 }
 0xba3   :  { %1111 = vmatmul.msk.f32.gmra.mxu3 %vm138_vm4, %v527_v45 }
 0xbab   :  { %1112 = vmatmul.msk.f32.gmra.mxu3 %vm138_vm4, %v528_v46 }
 0xc06   :  { %v399_v49 = vpop.f32.mrf.mxu3 }
 0xc07   :  { %v402_v50 = vadd.f32 %v399_v49, %v126_v48  ;;  %v131_v48 = vpop.f32.mrf.mxu0 }
 0xc08   :  { %v132_v49 = vadd.f32 %v1358_v7, %v131_v48 }
 0xc09   :  { %1169 = vtanh.f32 %v402_v50 }
 0xc0f   :  { %v1170_v51 = vpop.eup %1169 }
 0xc10   :  { %v404_v52 = vmul.f32 %v1170_v51, %v1361_v15 }
 0xc12   :  { %v405_v53 = vadd.f32 %v404_v52, %v1363_v17 }
 0xc14   :  { %408 = vrot.lane.b32.xlu2 %v405_v53, %s1244_s3  ;;  %v406_v56 = vmul.f32 %v405_v53, %v368_v32 }
 0xc6e   :  { %v409_v54 = vpop.permute.xlu2 %408 }
 0xc6f   :  { %v411_v55 = vmul.f32 %v409_v54, %v405_v53  ;;  %v1560_v54 = vld [vmem:[%s1696_s8] ss:$0 sm:$0xff] }
 0xc71   :  { %413 = vrot.lane.b32.xlu0 %v411_v55, %s1245_s27 }
 0xce3   :  { %v414_v57 = vpop.permute.xlu0 %413 }
 0xce4   :  { %v416_v58 = vadd.f32 %v414_v57, %v406_v56 }
 0xce6   :  { %1171 = vtanh.f32 %v416_v58 }
 0xcec   :  { %v1172_v59 = vpop.eup %1171 }
 0xced   :  { %419 = vrot.lane.b32.xlu1 %v1172_v59, %s1244_s3 }
 0xd5f   :  { %v420_v61 = vpop.permute.xlu1 %419 }
 0xd60   :  { %v422_v62 = vmul.f32 %v420_v61, %v405_v53 }
 0xd62   :  { %424 = vrot.lane.b32.xlu2 %v422_v62, %s1245_s27 }
 0xdbc   :  { %v425_v3 = vpop.permute.xlu2 %424 }
 0xdbd   :  { %427 = vst.msk [vmem:[#allocation2 + $0x28] sm:$0xff] %vm138_vm4, %v425_v3  ;;  %1106 = vmatmul.msk.f32.vlgmr.msra.gmra.mxu1 %vm138_vm4, %v425_v3 }
 0xdbe   :  { %717 = vmatpush.msra.mxu1 %v1464_v63 }
 0xdc0   :  { %718 = vmatpush.msra.mxu1 %v1469_v0 }
 0xdc2   :  { %719 = vmatpush.msra.mxu1 %v1476_v1 }
 0xdc4   :  { %v529_v4 = vld [vmem:[#allocation2 + $0x28] sm:$0xff]  ;;  %720 = vmatpush.msra.mxu1 %v1483_v2 }
 0xdc5   :  { %1113 = vmatmul.msk.f32.gmra.mxu3 %vm138_vm4, %v529_v4  ;;  %625 = vmatmul.f32.vlgmr.msrb.gmra.mxu1 %v1242_v6  ;;  %v581_v6 = vpop.f32.mrf.mxu3 }
 0xdc6   :  { %813 = vmatpush.msrb.mxu1 %v1464_v63  ;;  %v582_v12 = vadd.f32 %v1505_v11, %v581_v6 }
 0xdc8   :  { %814 = vmatpush.msrb.mxu1 %v1469_v0 }
 0xdca   :  { %815 = vmatpush.msrb.mxu1 %v1476_v1 }
 0xdcc   :  { %816 = vmatpush.msrb.mxu1 %v1483_v2 }
 0xdcd   :  { %v584_v52 = vpop.f32.mrf.mxu3 }
 0xdce   :  { %v585_v53 = vadd.f32 %v1505_v11, %v584_v52 }
 0xe3a   :  { %v447_v9 = vpop.f32.mrf.mxu1 }
 0xe3b   :  { %v450_v10 = vadd.f32 %v447_v9, %v129_v8 }
 0xe3d   :  { %1173 = vtanh.f32 %v450_v10 }
 0xe42   :  { %v626_v13 = vpop.f32.mrf.mxu1 }
 0xe43   :  { %v1174_v14 = vpop.eup %1173  ;;  %v629_v16 = vadd.f32 %v626_v13, %v582_v12 }
 0xe44   :  { %v452_v18 = vmul.f32 %v1174_v14, %v1361_v15  ;;  %v587_v14 = vpop.f32.mrf.mxu3 }
 0xe45   :  { %1175 = vtanh.f32 %v629_v16  ;;  %v588_v16 = vadd.f32 %v1505_v11, %v587_v14 }
 0xe46   :  { %v453_v19 = vadd.f32 %v452_v18, %v1363_v17 }
 0xe48   :  { %456 = vrot.lane.b32.xlu0 %v453_v19, %s1244_s3  ;;  %v454_v27 = vmul.f32 %v453_v19, %v416_v58 }
 0xe4b   :  { %v1176_v20 = vpop.eup %1175 }
 0xe4c   :  { %v631_v21 = vmul.f32 %v1176_v20, %v1361_v15 }
 0xe4e   :  { %v632_v22 = vadd.f32 %v631_v21, %v1363_v17 }
 0xe50   :  { %635 = vrot.lane.b32.xlu1 %v632_v22, %s1244_s3  ;;  %v633_v31 = vmul.f32 0.0, %v632_v22 }
 0xeba   :  { %v457_v23 = vpop.permute.xlu0 %456 }
 0xebb   :  { %v459_v24 = vmul.f32 %v457_v23, %v453_v19 }
 0xebd   :  { %461 = vrot.lane.b32.xlu2 %v459_v24, %s1245_s27 }
 0xec2   :  { %v636_v25 = vpop.permute.xlu1 %635 }
 0xec3   :  { %v638_v26 = vmul.f32 %v636_v25, %v632_v22 }
 0xec5   :  { %640 = vrot.lane.b32.xlu0 %v638_v26, %s1245_s27 }
 0xf17   :  { %v462_v28 = vpop.permute.xlu2 %461 }
 0xf18   :  { %v1516_v29 = vadd.f32 %v462_v28, %v454_v27 }
 0xf1a   :  { %1177 = vtanh.f32 %v1516_v29 }
 0xf20   :  { %v1178_v30 = vpop.eup %1177 }
 0xf21   :  { %467 = vrot.lane.b32.xlu1 %v1178_v30, %s1244_s3 }
 0xf37   :  { %v641_v32 = vpop.permute.xlu0 %640 }
 0xf38   :  { %v643_v33 = vadd.f32 %v641_v32, %v633_v31 }
 0xf3a   :  { %1179 = vtanh.f32 %v643_v33 }
 0xf40   :  { %v1180_v34 = vpop.eup %1179 }
 0xf41   :  { %646 = vrot.lane.b32.xlu2 %v1180_v34, %s1244_s3 }
 0xf93   :  { %v468_v35 = vpop.permute.xlu1 %467 }
 0xf94   :  { %v470_v36 = vmul.f32 %v468_v35, %v453_v19 }
 0xf96   :  { %472 = vrot.lane.b32.xlu0 %v470_v36, %s1245_s27  ;;  %v590_v36 = vpop.f32.mrf.mxu3 }
 0xf9b   :  { %v647_v37 = vpop.permute.xlu2 %646 }
 0xf9c   :  { %v649_v38 = vmul.f32 %v647_v37, %v632_v22  ;;  %v591_v37 = vadd.f32 %v1505_v11, %v590_v36 }
 0xf9e   :  { %651 = vrot.lane.b32.xlu1 %v649_v38, %s1245_s27 }
0x1008   :  { %v473_v44 = vpop.permute.xlu0 %472 }
0x1009   :  { %475 = vst.msk [vmem:[#allocation2 + $0x30] sm:$0xff] %vm138_vm4, %v473_v44  ;;  %1107 = vmatmul.msk.f32.vlgmr.msra.gmra.mxu2 %vm138_vm4, %v473_v44 }
0x100a   :  { %765 = vmatpush.msra.mxu2 %v1464_v63 }
0x100c   :  { %766 = vmatpush.msra.mxu2 %v1469_v0 }
0x100e   :  { %767 = vmatpush.msra.mxu2 %v1476_v1 }
0x1010   :  { %v652_v45 = vpop.permute.xlu1 %651  ;;  %v530_v46 = vld [vmem:[#allocation2 + $0x30] sm:$0xff]  ;;  %768 = vmatpush.msra.mxu2 %v1483_v2 }
0x1011   :  { %654 = vst.msk [vmem:[#allocation2] sm:$0xff] %vm138_vm4, %v652_v45  ;;  %1114 = vmatmul.msk.f32.gmra.mxu3 %vm138_vm4, %v530_v46  ;;  %1116 = vmatmul.msk.f32.vlgmr.msrb.gmra.mxu2 %vm138_vm4, %v652_v45 }
0x1012   :  { %861 = vmatpush.msrb.mxu2 %v1464_v63 }
0x1014   :  { %862 = vmatpush.msrb.mxu2 %v1469_v0 }
0x1016   :  { %863 = vmatpush.msrb.mxu2 %v1476_v1 }
0x1018   :  { %v991_v47 = vld [vmem:[#allocation2] sm:$0xff]  ;;  %864 = vmatpush.msrb.mxu2 %v1483_v2 }
0x1019   :  { %1123 = vmatmul.msk.f32.vlgmr.msrb.gmra.mxu0 %vm138_vm4, %v991_v47 }
0x108c   :  { %v495_v50 = vpop.f32.mrf.mxu2 }
0x108d   :  { %v1554_v51 = vadd.f32 %v495_v50, %v132_v49 }
0x1094   :  { %v674_v55 = vpop.f32.mrf.mxu2 }
0x1095   :  { %v677_v56 = vadd.f32 %v674_v55, %v585_v53  ;;  %v593_v53 = vpop.f32.mrf.mxu3 }
0x1096   :  { %v1048_v57 = vpop.f32.mrf.mxu0  ;;  %v594_v55 = vadd.f32 %v1505_v11, %v593_v53 }
0x1097   :  { %1181 = vtanh.f32 %v677_v56  ;;  %v1049_v58 = vadd.f32 %v1560_v54, %v1048_v57 }
0x1099   :  { %v1072_v59 = vmax.f32 %v1049_v58, 0.0 }
0x109b   :  { %1080 = vst [vmem:[%s1697_s9] sm:$0xff] %v1072_v59 }
0x109d   :  { %v1182_v7 = vpop.eup %1181 }
0x109e   :  { %v679_v60 = vmul.f32 %v1182_v7, %v1361_v15 }
0x10a0   :  { %v680_v61 = vadd.f32 %v679_v60, %v1363_v17 }
0x10a2   :  { %683 = vrot.lane.b32.xlu2 %v680_v61, %s1244_s3  ;;  %v681_v4 = vmul.f32 %v680_v61, %v643_v33 }
0x10fc   :  { %v684_v62 = vpop.permute.xlu2 %683 }
0x10fd   :  { %v686_v3 = vmul.f32 %v684_v62, %v680_v61 }
0x10ff   :  { %688 = vrot.lane.b32.xlu0 %v686_v3, %s1245_s27 }
0x1171   :  { %v689_v5 = vpop.permute.xlu0 %688 }
0x1172   :  { %v691_v8 = vadd.f32 %v689_v5, %v681_v4 }
0x1174   :  { %1183 = vtanh.f32 %v691_v8 }
0x117a   :  { %v1184_v9 = vpop.eup %1183 }
0x117b   :  { %694 = vrot.lane.b32.xlu1 %v1184_v9, %s1244_s3 }
0x11ed   :  { %v695_v10 = vpop.permute.xlu1 %694 }
0x11ee   :  { %v697_v6 = vmul.f32 %v695_v10, %v680_v61 }
0x11f0   :  { %699 = vrot.lane.b32.xlu2 %v697_v6, %s1245_s27  ;;  %v596_v6 = vpop.f32.mrf.mxu3 }
0x124a   :  { %v700_v12 = vpop.permute.xlu2 %699 }
0x124b   :  { %702 = vst.msk [vmem:[#allocation2 + $0x8] sm:$0xff] %vm138_vm4, %v700_v12  ;;  %1117 = vmatmul.msk.f32.vlgmr.msra.gmra.mxu1 %vm138_vm4, %v700_v12  ;;  %v597_v12 = vadd.f32 %v1505_v11, %v596_v6 }
0x124c   :  { %909 = vmatpush.msra.mxu1 %v1464_v63 }
0x124e   :  { %910 = vmatpush.msra.mxu1 %v1469_v0 }
0x1250   :  { %911 = vmatpush.msra.mxu1 %v1476_v1 }
0x1252   :  { %v992_v13 = vld [vmem:[#allocation2 + $0x8] sm:$0xff]  ;;  %912 = vmatpush.msra.mxu1 %v1483_v2 }
0x1253   :  { %1124 = vmatmul.msk.f32.gmra.mxu0 %vm138_vm4, %v992_v13 }
0x12c8   :  { %v722_v18 = vpop.f32.mrf.mxu1 }
0x12c9   :  { %v725_v19 = vadd.f32 %v722_v18, %v588_v16 }
0x12cb   :  { %1185 = vtanh.f32 %v725_v19 }
0x12d0   :  { %v1051_v20 = vpop.f32.mrf.mxu0 }
0x12d1   :  { %v1186_v21 = vpop.eup %1185  ;;  %v1052_v22 = vadd.f32 %v1560_v54, %v1051_v20 }
0x12d2   :  { %v727_v23 = vmul.f32 %v1186_v21, %v1361_v15 }
0x12d3   :  { %v1073_v24 = vmax.f32 %v1052_v22, 0.0 }
0x12d4   :  { %v728_v25 = vadd.f32 %v727_v23, %v1363_v17 }
0x12d5   :  { %1081 = vst [vmem:[%s1697_s9 + $0x8] sm:$0xff] %v1073_v24 }
0x12d6   :  { %731 = vrot.lane.b32.xlu0 %v728_v25, %s1244_s3  ;;  %v729_v28 = vmul.f32 %v728_v25, %v691_v8 }
0x1348   :  { %v732_v26 = vpop.permute.xlu0 %731 }
0x1349   :  { %v734_v27 = vmul.f32 %v732_v26, %v728_v25 }
0x134b   :  { %736 = vrot.lane.b32.xlu1 %v734_v27, %s1245_s27 }
0x13bd   :  { %v737_v30 = vpop.permute.xlu1 %736 }
0x13be   :  { %v739_v31 = vadd.f32 %v737_v30, %v729_v28 }
0x13c0   :  { %1187 = vtanh.f32 %v739_v31 }
0x13c6   :  { %v1188_v32 = vpop.eup %1187 }
0x13c7   :  { %742 = vrot.lane.b32.xlu2 %v1188_v32, %s1244_s3 }
0x1421   :  { %v743_v33 = vpop.permute.xlu2 %742 }
0x1422   :  { %v745_v34 = vmul.f32 %v743_v33, %v728_v25  ;;  %v599_v33 = vpop.f32.mrf.mxu3 }
0x1424   :  { %747 = vrot.lane.b32.xlu0 %v745_v34, %s1245_s27  ;;  %v600_v34 = vadd.f32 %v1505_v11, %v599_v33 }
0x1496   :  { %v748_v35 = vpop.permute.xlu0 %747 }
0x1497   :  { %750 = vst.msk [vmem:[#allocation2 + $0x10] sm:$0xff] %vm138_vm4, %v748_v35  ;;  %1118 = vmatmul.msk.f32.vlgmr.msra.gmra.mxu2 %vm138_vm4, %v748_v35 }
0x1498   :  { %957 = vmatpush.msra.mxu2 %v1464_v63 }
0x149a   :  { %958 = vmatpush.msra.mxu2 %v1469_v0 }
0x149c   :  { %959 = vmatpush.msra.mxu2 %v1476_v1 }
0x149e   :  { %960 = vmatpush.msra.mxu2 %v1483_v2  ;;  %v993_v30 = vld [vmem:[#allocation2 + $0x10] sm:$0xff] }
0x151a   :  { %v770_v38 = vpop.f32.mrf.mxu2 }
0x151b   :  { %v773_v39 = vadd.f32 %v770_v38, %v591_v37 }
0x151d   :  { %1189 = vtanh.f32 %v773_v39 }
0x1523   :  { %v1190_v44 = vpop.eup %1189 }
0x1524   :  { %v775_v45 = vmul.f32 %v1190_v44, %v1361_v15 }
0x1526   :  { %v776_v46 = vadd.f32 %v775_v45, %v1363_v17 }
0x1528   :  { %779 = vrot.lane.b32.xlu1 %v776_v46, %s1244_s3  ;;  %v777_v0 = vmul.f32 %v776_v46, %v739_v31 }
0x159a   :  { %v780_v63 = vpop.permute.xlu1 %779 }
0x159b   :  { %v782_v47 = vmul.f32 %v780_v63, %v776_v46 }
0x159d   :  { %784 = vrot.lane.b32.xlu2 %v782_v47, %s1245_s27 }
0x15f7   :  { %v785_v1 = vpop.permute.xlu2 %784 }
0x15f8   :  { %v787_v2 = vadd.f32 %v785_v1, %v777_v0 }
0x15fa   :  { %1191 = vtanh.f32 %v787_v2 }
0x1600   :  { %v1192_v48 = vpop.eup %1191 }
0x1601   :  { %790 = vrot.lane.b32.xlu0 %v1192_v48, %s1244_s3 }
0x1673   :  { %v791_v49 = vpop.permute.xlu0 %790 }
0x1674   :  { %v793_v50 = vmul.f32 %v791_v49, %v776_v46 }
0x1676   :  { %795 = vrot.lane.b32.xlu1 %v793_v50, %s1245_s27 }
0x16e8   :  { %v796_v52 = vpop.permute.xlu1 %795 }
0x16e9   :  { %798 = vst.msk [vmem:[#allocation2 + $0x18] sm:$0xff] %vm138_vm4, %v796_v52  ;;  %1119 = vmatmul.msk.f32.vlgmr.msrb.gmra.mxu1 %vm138_vm4, %v796_v52 }
0x16ea   :  { %1131 = vmatpush.msrb.mxu1 %v1527_v40 }
0x16ec   :  { %1133 = vmatpush.msrb.mxu1 %v1529_v41 }
0x16ee   :  { %1135 = vmatpush.msrb.mxu1 %v1532_v42 }
0x16f0   :  { %1137 = vmatpush.msrb.mxu1 %v1535_v43  ;;  %v994_v31 = vld [vmem:[#allocation2 + $0x18] sm:$0xff] }
0x1766   :  { %v818_v56 = vpop.f32.mrf.mxu1 }
0x1767   :  { %v821_v57 = vadd.f32 %v818_v56, %v594_v55 }
0x1769   :  { %1193 = vtanh.f32 %v821_v57 }
0x176f   :  { %v1194_v58 = vpop.eup %1193 }
0x1770   :  { %v823_v59 = vmul.f32 %v1194_v58, %v1361_v15 }
0x1772   :  { %v824_v7 = vadd.f32 %v823_v59, %v1363_v17 }
0x1774   :  { %827 = vrot.lane.b32.xlu2 %v824_v7, %s1244_s3  ;;  %v825_v62 = vmul.f32 %v824_v7, %v787_v2 }
0x17ce   :  { %v828_v60 = vpop.permute.xlu2 %827 }
0x17cf   :  { %v830_v61 = vmul.f32 %v828_v60, %v824_v7 }
0x17d1   :  { %832 = vrot.lane.b32.xlu0 %v830_v61, %s1245_s27 }
0x1843   :  { %v833_v3 = vpop.permute.xlu0 %832 }
0x1844   :  { %v835_v4 = vadd.f32 %v833_v3, %v825_v62 }
0x1846   :  { %1195 = vtanh.f32 %v835_v4 }
0x184c   :  { %v1196_v5 = vpop.eup %1195 }
0x184d   :  { %838 = vrot.lane.b32.xlu1 %v1196_v5, %s1244_s3 }
0x18bf   :  { %v839_v8 = vpop.permute.xlu1 %838 }
0x18c0   :  { %v841_v9 = vmul.f32 %v839_v8, %v824_v7 }
0x18c2   :  { %843 = vrot.lane.b32.xlu2 %v841_v9, %s1245_s27 }
0x191c   :  { %v844_v10 = vpop.permute.xlu2 %843 }
0x191d   :  { %846 = vst.msk [vmem:[#allocation2 + $0x20] sm:$0xff] %vm138_vm4, %v844_v10  ;;  %1120 = vmatmul.msk.f32.vlgmr.msrb.gmra.mxu2 %vm138_vm4, %v844_v10 }
0x191e   :  { %1132 = vmatpush.msrb.mxu2 %v1527_v40 }
0x1920   :  { %1134 = vmatpush.msrb.mxu2 %v1529_v41 }
0x1922   :  { %1136 = vmatpush.msrb.mxu2 %v1532_v42 }
0x1924   :  { %1138 = vmatpush.msrb.mxu2 %v1535_v43  ;;  %v995_v32 = vld [vmem:[#allocation2 + $0x20] sm:$0xff] }
0x19a0   :  { %v866_v13 = vpop.f32.mrf.mxu2 }
0x19a1   :  { %v869_v14 = vadd.f32 %v866_v13, %v597_v12 }
0x19a3   :  { %1197 = vtanh.f32 %v869_v14 }
0x19a4   :  { %1199 = vtanh.f32 %v1554_v51 }
0x19a9   :  { %v1198_v16 = vpop.eup %1197 }
0x19aa   :  { %v871_v18 = vmul.f32 %v1198_v16, %v1361_v15  ;;  %v1200_v42 = vpop.eup %1199 }
0x19ab   :  { %v500_v43 = vmul.f32 %v1200_v42, %v1361_v15 }
0x19ac   :  { %v872_v19 = vadd.f32 %v871_v18, %v1363_v17 }
0x19ad   :  { %v501_v20 = vadd.f32 %v500_v43, %v1363_v17 }
0x19ae   :  { %875 = vrot.lane.b32.xlu0 %v872_v19, %s1244_s3  ;;  %v873_v21 = vmul.f32 %v872_v19, %v835_v4 }
0x19af   :  { %v502_v44 = vmul.f32 %v501_v20, %v1516_v29 }
0x1a20   :  { %v876_v40 = vpop.permute.xlu0 %875 }
0x1a21   :  { %v878_v41 = vmul.f32 %v876_v40, %v872_v19 }
0x1a23   :  { %880 = vrot.lane.b32.xlu1 %v878_v41, %s1245_s27 }
0x1a2b   :  { %504 = vrot.lane.b32.xlu1 %v501_v20, %s1244_s3 }
0x1a95   :  { %v881_v22 = vpop.permute.xlu1 %880 }
0x1a96   :  { %v883_v23 = vadd.f32 %v881_v22, %v873_v21 }
0x1a98   :  { %1201 = vtanh.f32 %v883_v23 }
0x1a9d   :  { %v505_v26 = vpop.permute.xlu1 %504 }
0x1a9e   :  { %v1202_v24 = vpop.eup %1201  ;;  %v507_v27 = vmul.f32 %v505_v26, %v501_v20 }
0x1a9f   :  { %886 = vrot.lane.b32.xlu2 %v1202_v24, %s1244_s3 }
0x1af9   :  { %v887_v25 = vpop.permute.xlu2 %886 }
0x1afa   :  { %v889_v51 = vmul.f32 %v887_v25, %v872_v19 }
0x1afc   :  { %891 = vrot.lane.b32.xlu0 %v889_v51, %s1245_s27 }
0x1b04   :  { %509 = vrot.lane.b32.xlu0 %v507_v27, %s1245_s27 }
0x1b6e   :  { %v892_v28 = vpop.permute.xlu0 %891 }
0x1b6f   :  { %894 = vst.msk [vmem:[#allocation2 + $0x28] sm:$0xff] %vm138_vm4, %v892_v28  ;;  %1121 = vmatmul.msk.f32.vlgmr.msra.gmra.mxu1 %vm138_vm4, %v892_v28 }
0x1b76   :  { %v510_v37 = vpop.permute.xlu0 %509  ;;  %v996_v8 = vld [vmem:[#allocation2 + $0x28] sm:$0xff] }
0x1b77   :  { %1125 = vmatmul.msk.f32.vlgmr.msrb.gmra.mxu1 %vm138_vm4, %v993_v30  ;;  %v512_v63 = vadd.f32 %v510_v37, %v502_v44 }
0x1b7f   :  { %1126 = vmatmul.msk.f32.gmra.mxu1 %vm138_vm4, %v994_v31 }
0x1b87   :  { %1127 = vmatmul.msk.f32.gmra.mxu1 %vm138_vm4, %v995_v32 }
0x1bec   :  { %v914_v35 = vpop.f32.mrf.mxu1 }
0x1bed   :  { %v917_v36 = vadd.f32 %v914_v35, %v600_v34 }
0x1bef   :  { %1203 = vtanh.f32 %v917_v36 }
0x1bf0   :  { %1205 = vtanh.f32 %v512_v63 }
0x1bf4   :  { %v1054_v38 = vpop.f32.mrf.mxu1 }
0x1bf5   :  { %v1204_v39 = vpop.eup %1203  ;;  %v1055_v45 = vadd.f32 %v1560_v54, %v1054_v38 }
0x1bf6   :  { %v919_v46 = vmul.f32 %v1204_v39, %v1361_v15  ;;  %v1206_v29 = vpop.eup %1205 }
0x1bf7   :  { %v1074_v47 = vmax.f32 %v1055_v45, 0.0 }
0x1bf8   :  { %v920_v0 = vadd.f32 %v919_v46, %v1363_v17 }
0x1bf9   :  { %1082 = vst [vmem:[%s1697_s9 + $0x10] sm:$0xff] %v1074_v47 }
0x1bfa   :  { %923 = vrot.lane.b32.xlu2 %v920_v0, %s1244_s3  ;;  %v921_v58 = vmul.f32 %v920_v0, %v883_v23 }
0x1bfc   :  { %v1057_v1 = vpop.f32.mrf.mxu1 }
0x1bfd   :  { %v1058_v2 = vadd.f32 %v1560_v54, %v1057_v1 }
0x1bff   :  { %v1075_v48 = vmax.f32 %v1058_v2, 0.0 }
0x1c01   :  { %1083 = vst [vmem:[%s1697_s9 + $0x18] sm:$0xff] %v1075_v48 }
0x1c02   :  { %515 = vrot.lane.b32.xlu2 %v1206_v29, %s1244_s3 }
0x1c04   :  { %v1060_v49 = vpop.f32.mrf.mxu1 }
0x1c05   :  { %v1061_v50 = vadd.f32 %v1560_v54, %v1060_v49 }
0x1c07   :  { %v1076_v52 = vmax.f32 %v1061_v50, 0.0 }
0x1c09   :  { %1084 = vst [vmem:[%s1697_s9 + $0x20] sm:$0xff] %v1076_v52 }
0x1c54   :  { %v924_v53 = vpop.permute.xlu2 %923 }
0x1c55   :  { %v926_v55 = vmul.f32 %v924_v53, %v920_v0 }
0x1c57   :  { %928 = vrot.lane.b32.xlu1 %v926_v55, %s1245_s27 }
0x1c5c   :  { %v516_v56 = vpop.permute.xlu2 %515 }
0x1c5d   :  { %v518_v57 = vmul.f32 %v516_v56, %v501_v20 }
0x1c5f   :  { %520 = vrot.lane.b32.xlu1 %v518_v57, %s1245_s27 }
0x1cc9   :  { %v929_v59 = vpop.permute.xlu1 %928 }
0x1cca   :  { %v931_v7 = vadd.f32 %v929_v59, %v921_v58 }
0x1ccc   :  { %1207 = vtanh.f32 %v931_v7 }
0x1cd1   :  { %v521_v60 = vpop.permute.xlu1 %520 }
0x1cd2   :  { %v1208_v61 = vpop.eup %1207  ;;  %523 = vst.msk [vmem:[#allocation2 + $0x38] sm:$0xff] %vm138_vm4, %v521_v60 }
0x1cd3   :  { %934 = vrot.lane.b32.xlu0 %v1208_v61, %s1244_s3 }
0x1cd9   :  { %v531_v62 = vld [vmem:[#allocation2 + $0x38] sm:$0xff] }
0x1cda   :  { %1115 = vmatmul.msk.f32.gmra.mxu3 %vm138_vm4, %v531_v62 }
0x1d45   :  { %v935_v3 = vpop.permute.xlu0 %934 }
0x1d46   :  { %v937_v4 = vmul.f32 %v935_v3, %v920_v0 }
0x1d48   :  { %939 = vrot.lane.b32.xlu2 %v937_v4, %s1245_s27 }
0x1d5d   :  { %v602_v10 = vpop.f32.mrf.mxu3 }
0x1d5e   :  { %v603_v6 = vadd.f32 %v1505_v11, %v602_v10 }
0x1da2   :  { %v940_v5 = vpop.permute.xlu2 %939 }
0x1da3   :  { %942 = vst.msk [vmem:[#allocation2 + $0x30] sm:$0xff] %vm138_vm4, %v940_v5  ;;  %1122 = vmatmul.msk.f32.vlgmr.msra.gmra.mxu2 %vm138_vm4, %v940_v5 }
0x1daa   :  { %v997_v9 = vld [vmem:[#allocation2 + $0x30] sm:$0xff] }
0x1dab   :  { %1128 = vmatmul.msk.f32.vlgmr.msrb.gmra.mxu2 %vm138_vm4, %v996_v8 }
0x1db3   :  { %1129 = vmatmul.msk.f32.gmra.mxu2 %vm138_vm4, %v997_v9 }
0x1e26   :  { %v962_v12 = vpop.f32.mrf.mxu2 }
0x1e27   :  { %v965_v13 = vadd.f32 %v962_v12, %v603_v6 }
0x1e29   :  { %1209 = vtanh.f32 %v965_v13 }
0x1e2e   :  { %v1063_v14 = vpop.f32.mrf.mxu2 }
0x1e2f   :  { %v1210_v16 = vpop.eup %1209  ;;  %v1064_v18 = vadd.f32 %v1560_v54, %v1063_v14 }
0x1e30   :  { %v967_v19 = vmul.f32 %v1210_v16, %v1361_v15 }
0x1e31   :  { %v1077_v40 = vmax.f32 %v1064_v18, 0.0 }
0x1e32   :  { %v968_v41 = vadd.f32 %v967_v19, %v1363_v17 }
0x1e33   :  { %1085 = vst [vmem:[%s1697_s9 + $0x28] sm:$0xff] %v1077_v40 }
0x1e34   :  { %971 = vrot.lane.b32.xlu0 %v968_v41, %s1244_s3  ;;  %v969_v15 = vmul.f32 %v968_v41, %v931_v7 }
0x1e36   :  { %v1066_v42 = vpop.f32.mrf.mxu2 }
0x1e37   :  { %v1067_v11 = vadd.f32 %v1560_v54, %v1066_v42 }
0x1e39   :  { %v1078_v43 = vmax.f32 %v1067_v11, 0.0 }
0x1e3b   :  { %1086 = vst [vmem:[%s1697_s9 + $0x30] sm:$0xff] %v1078_v43 }
0x1ea6   :  { %v972_v20 = vpop.permute.xlu0 %971 }
0x1ea7   :  { %v974_v21 = vmul.f32 %v972_v20, %v968_v41 }
0x1ea9   :  { %976 = vrot.lane.b32.xlu1 %v974_v21, %s1245_s27 }
0x1f1b   :  { %v977_v17 = vpop.permute.xlu1 %976 }
0x1f1c   :  { %v979_v22 = vadd.f32 %v977_v17, %v969_v15 }
0x1f1e   :  { %1211 = vtanh.f32 %v979_v22 }
0x1f24   :  { %v1212_v23 = vpop.eup %1211 }
0x1f25   :  { %982 = vrot.lane.b32.xlu2 %v1212_v23, %s1244_s3 }
0x1f7f   :  { %v983_v24 = vpop.permute.xlu2 %982 }
0x1f80   :  { %v985_v25 = vmul.f32 %v983_v24, %v968_v41 }
0x1f82   :  { %987 = vrot.lane.b32.xlu0 %v985_v25, %s1245_s27 }
0x1ff4   :  { %v988_v51 = vpop.permute.xlu0 %987 }
0x1ff5   :  { %990 = vst.msk [vmem:[#allocation2 + $0x38] sm:$0xff] %vm138_vm4, %v988_v51 }
0x1ffc   :  { %v998_v26 = vld [vmem:[#allocation2 + $0x38] sm:$0xff] }
0x1ffd   :  { %1130 = vmatmul.msk.f32.gmra.mxu2 %vm138_vm4, %v998_v26 }
0x2080   :  { %v1069_v27 = vpop.f32.mrf.mxu2 }
0x2081   :  { %v1070_v28 = vadd.f32 %v1560_v54, %v1069_v27 }
0x2083   :  { %v1079_v30 = vmax.f32 %v1070_v28, 0.0 }
0x2085   :  { %1087 = vst [vmem:[%s1697_s9 + $0x38] sm:$0xff] %v1079_v30 }
0x2086   :  { %1092 = vsyncpa [#allocation4], 1 }

</bundles_post_ra>
